<compile_context>
chip_gen: v7x
topology: tpu7x:2x2x1
jax: 0.10.0
libtpu: 0.0.40
codegen_flags: <defaults>
</compile_context>

<pallas_src>
import jax
import jax.numpy as jnp
import numpy as np
from jax.experimental import pallas as pl
from jax.experimental.pallas import tpu as pltpu

OUT_H = 640
OUT_W = 640
SCALE = 0.003921569               # literal constant used by the torch module


def _one_hot_selectors(H, W):
    # torch/ONNX 'nearest' floor rule: src = floor(dst * in / out), exact in int math.
    ri = (np.arange(OUT_H, dtype=np.int64) * H) // OUT_H        # (OUT_H,)
    ci = (np.arange(OUT_W, dtype=np.int64) * W) // OUT_W        # (OUT_W,)
    row_oh = ri[:, None] == np.arange(H)[None, :]               # (OUT_H, H)
    col_oh = np.arange(W)[:, None] == ci[None, :]               # (W, OUT_W)
    return row_oh, col_oh


def _make_kernel(compute_dtype, row_tile, cols_first):
    """Kernel for one (channel, output-row-tile) grid step.

    x_ref:      (1, H, W)    uint8/int8/float32 channel slab (BGR->RGB via index_map)
    row_oh_ref: (OUT_H, H)   one-hot row selector, VMEM-resident, single-buffered
    col_oh_ref: (W, OUT_W)   one-hot column selector, VMEM-resident, single-buffered
    o_ref:      (1, row_tile, OUT_W) float32
    """
    def kernel(x_ref, row_oh_ref, col_oh_ref, o_ref):
        # Cast to the MXU compute dtype in-kernel (exact: uint8/int8 values are
        # exactly representable in bf16; a no-op for the float32 path).  With at
        # most 2 grid steps per channel this cast happens <=2x per channel.
        x = x_ref[0].astype(compute_dtype)                           # (H, W)
        if cols_first:
            # Hoisted column gather: W -> OUT_W first (fewer MACs when W >= H).
            # Only used when the whole 640-row output is produced in one step.
            tmp = jnp.dot(x, col_oh_ref[...],
                          preferred_element_type=jnp.float32)        # (H, OUT_W)
            tmp = tmp.astype(compute_dtype)                           # exact (selected pixels)
            out = jnp.dot(row_oh_ref[...], tmp,
                          preferred_element_type=jnp.float32)        # (OUT_H, OUT_W)
        else:
            # Rows-first: slice this step's rows out of the resident selector.
            start = pl.multiple_of(pl.program_id(1) * row_tile, row_tile)
            rsel = row_oh_ref[pl.ds(start, row_tile), :]              # (row_tile, H)
            tmp = jnp.dot(rsel, x, preferred_element_type=jnp.float32)  # (row_tile, W)
            tmp = tmp.astype(compute_dtype)
            out = jnp.dot(tmp, col_oh_ref[...],
                          preferred_element_type=jnp.float32)        # (row_tile, OUT_W)
        # 1/255 stays a float32 multiply (0.003921569 is not representable in bf16).
        o_ref[0] = out * jnp.float32(SCALE)

    return kernel


def _resident_spec(block_shape, index_map):
    """BlockSpec for an operand whose block index never changes: fetched once,
    single-buffered (Buffered(1)) when the running JAX supports pipeline_mode."""
    try:
        return pl.BlockSpec(block_shape, index_map, pipeline_mode=pl.Buffered(1))
    except Exception:                      # older JAX: fall back to default buffering
        return pl.BlockSpec(block_shape, index_map)


def _tpu_vmem_capacity():
    try:
        return int(pltpu.get_tpu_info().vmem_capacity_bytes)
    except Exception:
        return 64 * 1024 * 1024            # conservative (v7x-sized) fallback


@jax.jit
def preprocess(x_hwc):
    """x_hwc: (H, W, 3) BGR image -> (1, 3, 640, 640) float32 (matches PreProcess)."""
    H, W, C = x_hwc.shape
    assert C == 3

    # bf16 compute only for 1-byte dtypes (exact); everything else -> float32 compute,
    # which matches torch's `.to(float32)` exactly (incl. uint16/int32 images).
    byte_dtypes = (np.dtype(np.uint8), np.dtype(np.int8), np.dtype(bool))
    if np.dtype(x_hwc.dtype) in byte_dtypes:
        compute_dtype = jnp.bfloat16
        transfer_dtype = jnp.uint8 if np.dtype(x_hwc.dtype) == np.dtype(bool) else x_hwc.dtype
    else:
        compute_dtype = jnp.float32
        transfer_dtype = jnp.float32

    # Only wrapper-side prep: HWC -> CHW transpose at the *narrow* transfer dtype
    # (uint8 stays uint8).  No float staging array; the up-cast happens in-kernel.
    x_chw = jnp.transpose(x_hwc, (2, 0, 1)).astype(transfer_dtype)   # (3, H, W), BGR order

    row_oh_np, col_oh_np = _one_hot_selectors(H, W)
    row_oh = jnp.asarray(row_oh_np, dtype=compute_dtype)             # (OUT_H, H)
    col_oh = jnp.asarray(col_oh_np, dtype=compute_dtype)             # (W, OUT_W)

    # ---- per-generation tiling / VMEM budget -------------------------------
    vmem_cap = _tpu_vmem_capacity()
    if vmem_cap >= 100 * 2**20:            # v5e / v6e / v5p class: 128 MiB VMEM, 1 TC
        row_tile = 640                     # grid (3, 1): one step per channel
        gen_cap = 100 * 2**20
    else:                                  # v7x class: 64 MiB VMEM, 2 TCs
        row_tile = 320                     # grid (3, 2): 3 balanced steps per TC
        gen_cap = 48 * 2**20
    gen_cap = min(gen_cap, max(int(0.85 * vmem_cap), 8 * 2**20))
    n_row_tiles = OUT_H // row_tile
    cols_first = (n_row_tiles == 1) and (W >= H)

    t_item = np.dtype(transfer_dtype).itemsize
    c_item = np.dtype(compute_dtype).itemsize
    tmp_elems = H * OUT_W if cols_first else row_tile * W
    vmem_need = (2 * H * W * t_item            # channel slab (double-buffered)
                 + OUT_H * H * c_item          # resident row selector (single buffer)
                 + W * OUT_W * c_item          # resident col selector (single buffer)
                 + 2 * row_tile * OUT_W * 4    # output tile (double-buffered)
                 + H * W * c_item              # in-kernel cast slab
                 + tmp_elems * (4 + c_item)    # matmul intermediate (+ cast copy)
                 + row_tile * OUT_W * 4)       # final f32 tile before store
    vmem_limit = int(min(max(int(1.5 * vmem_need), 32 * 2**20), gen_cap))

    kernel = _make_kernel(compute_dtype, row_tile, cols_first)

    grid_spec = pltpu.PrefetchScalarGridSpec(
        num_scalar_prefetch=0,
        grid=(3, n_row_tiles),                 # channel outer, row tile inner
        in_specs=[
            # BGR -> RGB folded into the index_map: output channel c reads source
            # channel 2 - c.  Block index is constant along the inner row-tile
            # axis, so each channel slab is DMA'd exactly once.
            pl.BlockSpec((1, H, W), lambda c, r: (2 - c, 0, 0)),
            _resident_spec((OUT_H, H), lambda c, r: (0, 0)),      # whole row selector resident
            _resident_spec((W, OUT_W), lambda c, r: (0, 0)),      # column selector resident
        ],
        out_specs=pl.BlockSpec((1, row_tile, OUT_W), lambda c, r: (c, r, 0)),
    )

    out = pl.pallas_call(
        kernel,
        out_shape=jax.ShapeDtypeStruct((3, OUT_H, OUT_W), jnp.float32),
        grid_spec=grid_spec,
        compiler_params=pltpu.CompilerParams(
            dimension_semantics=("parallel", "parallel"),
            vmem_limit_bytes=vmem_limit,
        ),
    )(x_chw, row_oh, col_oh)

    # torch: unsqueeze(0) -> NCHW
    return out.reshape(1, 3, OUT_H, OUT_W)


def _reference(x_hwc_np):
    x = np.asarray(x_hwc_np).astype(np.float32)
    x = np.transpose(x, (2, 0, 1))                    # (3, H, W), BGR
    x = x[[2, 1, 0]]                                  # RGB
    H, W = x.shape[1], x.shape[2]
    ri = (np.arange(OUT_H) * H) // OUT_H              # torch 'nearest' floor rule
    ci = (np.arange(OUT_W) * W) // OUT_W
    x = x[:, ri][:, :, ci]
    return x[None, ...] * np.float32(SCALE)


if __name__ == "__main__":
    # Case 1: uint8 BGR image (bf16 MXU fast path, exact), W > H -> cols-first order.
    key = jax.random.PRNGKey(0)
    H, W = 40, 56
    x_u8 = jax.random.randint(key, (H, W, 3), 0, 256, dtype=jnp.int32).astype(jnp.uint8)
    y = jax.block_until_ready(preprocess(x_u8))
    assert y.shape == (1, 3, OUT_H, OUT_W), y.shape
    assert y.dtype == jnp.float32
    np.testing.assert_allclose(np.asarray(y), _reference(np.asarray(x_u8)),
                               rtol=1e-6, atol=1e-6)

    # Case 2: float32 image (exact f32 path), H > W -> rows-first order.
    key2 = jax.random.PRNGKey(1)
    H2, W2 = 56, 40
    x_f32 = jnp.round(jax.random.uniform(key2, (H2, W2, 3), jnp.float32) * 255.0)
    y2 = jax.block_until_ready(preprocess(x_f32))
    np.testing.assert_allclose(np.asarray(y2), _reference(np.asarray(x_f32)),
                               rtol=1e-6, atol=1e-6)

    print("KERNEL_OK")
</pallas_src>

<mosaic_0001>
module attributes {stable_mosaic.version = 11 : i64} {
  func.func @kernel(%arg0: i32, %arg1: i32, %arg2: memref<1x40x56xi8, #tpu.memory_space<vmem>>, %arg3: memref<640x40xbf16, #tpu.memory_space<vmem>>, %arg4: memref<56x640xbf16, #tpu.memory_space<vmem>>, %arg5: memref<1x320x640xf32, #tpu.memory_space<vmem>>) attributes {dimension_semantics = [#tpu.dimension_semantics<parallel>, #tpu.dimension_semantics<parallel>], iteration_bounds = array<i64: 3, 2>, scalar_prefetch = 0 : i64, scratch_operands = 0 : i64, tpu.core_type = #tpu.core_type<tc>, window_params = [{transform_indices = @transform_0, window_bounds = array<i64: 1, 40, 56>}, {pipeline_mode = #tpu.pipeline_mode<synchronous>, transform_indices = @transform_1, window_bounds = array<i64: 640, 40>}, {pipeline_mode = #tpu.pipeline_mode<synchronous>, transform_indices = @transform_2, window_bounds = array<i64: 56, 640>}, {transform_indices = @transform_3, window_bounds = array<i64: 1, 320, 640>}]} {
    %c0 = arith.constant 0 : index
    %c0_0 = arith.constant 0 : index
    %c0_1 = arith.constant 0 : index
    %0 = vector.load %arg2[%c0, %c0_0, %c0_1] : memref<1x40x56xi8, #tpu.memory_space<vmem>>, vector<1x40x56xi8>
    %1 = vector.shape_cast %0 : vector<1x40x56xi8> to vector<40x56xi8>
    %2 = arith.uitofp %1 : vector<40x56xi8> to vector<40x56xbf16>
    %c320_i32 = arith.constant 320 : i32
    %3 = arith.muli %arg1, %c320_i32 : i32
    %4 = tpu.assume_multiple %3, 320 : i32
    %5 = arith.index_cast %4 : i32 to index
    %c0_2 = arith.constant 0 : index
    %6 = vector.load %arg3[%5, %c0_2] : memref<640x40xbf16, #tpu.memory_space<vmem>>, vector<320x40xbf16>
    %cst = arith.constant dense<0.000000e+00> : vector<320x56xf32>
    %7 = tpu.matmul %6, %2, %cst {dimension_numbers = #tpu.dot_dimension_numbers<[1], [0], [0], [1], [0, 0, 1, 1], [], []>} : vector<320x40xbf16>, vector<40x56xbf16>, vector<320x56xf32> -> vector<320x56xf32>
    %8 = arith.truncf %7 : vector<320x56xf32> to vector<320x56xbf16>
    %c0_3 = arith.constant 0 : index
    %c0_4 = arith.constant 0 : index
    %9 = vector.load %arg4[%c0_3, %c0_4] : memref<56x640xbf16, #tpu.memory_space<vmem>>, vector<56x640xbf16>
    %cst_5 = arith.constant dense<0.000000e+00> : vector<320x640xf32>
    %10 = tpu.matmul %8, %9, %cst_5 {dimension_numbers = #tpu.dot_dimension_numbers<[1], [0], [0], [1], [0, 0, 1, 1], [], []>} : vector<320x56xbf16>, vector<56x640xbf16>, vector<320x640xf32> -> vector<320x640xf32>
    %cst_6 = arith.constant 0.00392156886 : f32
    %11 = vector.broadcast %cst_6 : f32 to vector<320x640xf32>
    %12 = arith.mulf %10, %11 : vector<320x640xf32>
    %c0_7 = arith.constant 0 : index
    %c0_8 = arith.constant 0 : index
    %c0_9 = arith.constant 0 : index
    %13 = vector.load %arg5[%c0_7, %c0_8, %c0_9] : memref<1x320x640xf32, #tpu.memory_space<vmem>>, vector<1x320x640xf32>
    %14 = vector.shape_cast %13 : vector<1x320x640xf32> to vector<320x640xf32>
    %15 = vector.shape_cast %12 : vector<320x640xf32> to vector<1x320x640xf32>
    tpu.vector_store %arg5[%c0_7, %c0_8, %c0_9], %15 {strides = array<i32>} : memref<1x320x640xf32, #tpu.memory_space<vmem>>, vector<1x320x640xf32>,
    return
  }
  func.func @transform_0(%arg0: i32, %arg1: i32) -> (i32, i32, i32) {
    %c2_i32 = arith.constant 2 : i32
    %0 = arith.subi %c2_i32, %arg0 : i32
    %c0_i32 = arith.constant 0 : i32
    %c0_i32_0 = arith.constant 0 : i32
    %c0_i32_1 = arith.constant 0 : i32
    return %0, %c0_i32, %c0_i32_0 : i32, i32, i32
  }
  func.func @transform_1(%arg0: i32, %arg1: i32) -> (i32, i32) {
    %c0_i32 = arith.constant 0 : i32
    %c0_i32_0 = arith.constant 0 : i32
    %c0_i32_1 = arith.constant 0 : i32
    return %c0_i32, %c0_i32_0 : i32, i32
  }
  func.func @transform_2(%arg0: i32, %arg1: i32) -> (i32, i32) {
    %c0_i32 = arith.constant 0 : i32
    %c0_i32_0 = arith.constant 0 : i32
    %c0_i32_1 = arith.constant 0 : i32
    return %c0_i32, %c0_i32_0 : i32, i32
  }
  func.func @transform_3(%arg0: i32, %arg1: i32) -> (i32, i32, i32) {
    %c0_i32 = arith.constant 0 : i32
    %c0_i32_0 = arith.constant 0 : i32
    return %arg0, %arg1, %c0_i32 : i32, i32, i32
  }
}

</mosaic_0001>

<bundles_post_ra>
// kernel: preprocess.1
= control target key start
LH: loop header
LB: loop body
LE: loop exit
PB: predicated region body
PF: predicated region fallthrough
CT: control target
= control target key end

     0   :  { %s3528_s0 = inlined_call_operand.hbm [shape: u8[3,40,56], index: 0, kind: input, shape index: {}]   ;;  %s3529_s1 = inlined_call_operand.hbm [shape: bf16[640,40], index: 1, kind: input, shape index: {}]   ;;  %s3530_s2 = inlined_call_operand.hbm [shape: bf16[56,640], index: 2, kind: input, shape index: {}]   ;;  %s3531_s3 = inlined_call_operand.hbm [shape: f32[3,640,640], index: 3, kind: output, shape index: {}]  }
   0x1   :  { %3543 = sst [smem:[#allocation17_spill]] %s3529_s1 }
   0x2   :  { %3544 = sst [smem:[#allocation18_spill]] %s3530_s2 }
   0x3   :  { %3545 = sst [smem:[#allocation19_spill]] %s3531_s3 }
   0x4   :  { %8 = vsyncpa [#allocation3], 0 }
   0x5   :  { %10 = vsyncpa [#allocation3 + $0x1], 0 }
   0x6   :  { %11 = vsyncpa [#allocation6], 0 }
   0x7   :  { %12 = vsyncpa [#allocation4], 0 }
   0x8   :  { %14 = vsyncpa [#allocation4 + $0x1], 0  ;;  %s2772_s12 = smov 0   ;;  %s2774_s13 = smov 0  }
   0x9   :  { %s2776_s14 = smov 0   ;;  %s2778_s15 = smov 0  }
   0xa   :  { %s2780_s16 = smov 0   ;;  %s2782_s17 = smov 0  }
   0xb   :  { %s2784_s18 = smov 0   ;;  %s2786_s19 = smov 0  }
   0xc   :  { %s2788_s20 = smov 0   ;;  %s2790_s21 = smov 0  }
   0xd   :  { %s2792_s22 = smov 0  }
   0xe LB: > { %3546 = sst [smem:[#allocation12_spill]] %s2697_s12  ;;  %s2058_s23 = sadd.s32 4294967295, %s2737_s22   ;;  %s2737_s22 = sphi %s2792_s22, %s20_s22   ;;  %s2733_s21 = sphi %s2790_s21, %s3581_s21   ;;  %s2729_s20 = sphi %s2788_s20, %s3572_s20   ;;  %s2725_s19 = sphi %s2786_s19, %s3580_s19   ;;  %s2721_s18 = sphi %s2784_s18, %s3571_s18   ;;  %s2717_s17 = sphi %s2782_s17, %s3579_s17   ;;  %s2713_s16 = sphi %s2780_s16, %s3578_s16   ;;  %s2709_s15 = sphi %s2778_s15, %s3577_s15   ;;  %s2705_s14 = sphi %s2776_s14, %s3576_s14   ;;  %s2701_s13 = sphi %s2774_s13, %s3575_s13   ;;  %s2697_s12 = sphi %s2772_s12, %s3574_s12  }
   0xf   : > { %3547 = sst [smem:[#allocation13_spill]] %s2729_s20  ;;  %s2059_s24 = sadd.s32 4294967294, %s2737_s22  }
  0x10   : > { %p54_p0 = scmp.ne.s32.totalorder %s2713_s16, %s2709_s15  ;;  %p2828_p1 = scmp.eq.s32.totalorder %s2058_s23, 0 }
  0x11   : > { %p121_p2 = scmp.ne.s32.totalorder %s2705_s14, %s2701_s13  ;;  %p122_p4 = scmp.eq.s32.totalorder %s2058_s23, 5 }
  0x12   : > { %s3548_s25 = scalar_select %p2828_p1, 1, 0 }
  0x13   : > { %p2837_p3 = por %p2828_p1, %p54_p0  ;;  %p127_p5 = scmp.ne.s32.totalorder %s2701_s13, %s2697_s12 }
  0x14   : > { %p128_p6 = scmp.eq.s32.totalorder %s2059_s24, 5  ;;  %p2843_p7 = por %p122_p4, %p121_p2 }
  0x15   : > { %s3549_s27 = scalar_select %p2837_p3, 1, 0 }
  0x16   : > { %s3550_s28 = scalar_select %p2843_p7, 1, 0 }
  0x17   : > { %p2060_p8 = scmp.ge.s32.totalorder %s2737_s22, 1  ;;  %p2848_p9 = por %p128_p6, %p127_p5 }
  0x18   : > { %p135_p10 = scmp.lt.s32.totalorder %s2737_s22, 7  ;;  %s2739_s4 = smov [#allocation5]  }
  0x19   : > { %s3551_s29 = scalar_select %p2848_p9, 1, 0 }
  0x1a   : > { %p2853_p11 = pnand %p2060_p8, %p135_p10  ;;  %s147_s5 = sshll.u32 %s2739_s4, 4  ;;  %s148_s5 = int_to_ptr.vmem [resolvable:$true] %s147_s5 }
  0x1b   : > { %3552 = sst [smem:[#allocation14_spill]] %s3551_s29  ;;  %s2740_s7 = smov [#allocation7]  }
  0x1c   : > { %s3553_s30 = scalar_select %p2853_p11, 1, 0 }
  0x1d   : > { %p2358_p12 = pneg %p2853_p11  ;;  %s160_s8 = sshll.u32 %s2740_s7, 4  ;;  %s2865_s8 = int_to_ptr.vmem [resolvable:$true] %s160_s8 }
  0x1e   : > { %s3555_s1 = sld [smem:[#allocation17_spill]] }
  0x1f   : > { %p2861_p13 = pnand %p2358_p12, %p2828_p1 }
  0x21   : > { %p2527_p2 = pneg %p2861_p13 }
  0x24   : > { %s2525_s11 = scalar_lea.hbm %s3555_s1, 5120 }
  0x25   : > { %p2526_p0 = scmp.ne.s32.totalorder %s3555_s1, %s2525_s11  ;;  %p2532_p6 = scmp.lt.u32.totalorder %s2525_s11, %s3555_s1 }
  0x27   : > { %p2528_p4 = pnand %p2527_p2, %p2526_p0 }
  0x29   : > { %p2529_p5 = pneg %p2528_p4 }
  0x2b   : > { %p2534_p8 = pnand %p2532_p6, %p2529_p5 }
  0x2d   : > { %2537 = shalt.err (!%p2534_p8)
}
  0x2e   : > { %s2538_s7 = scalar_lea.vmem %s148_s5, 5120  ;;  %p2546_p7 = scmp.lt.s32.totalorder %s148_s5, %s148_s5 }
  0x2f   : > { %p2539_p10 = scmp.ne.s32.totalorder %s148_s5, %s2538_s7  ;;  %p2547_p1 = scmp.lt.s32.totalorder %s2538_s7, %s2538_s7 }
  0x31   : > { %p2541_p12 = pnand %p2539_p10, %p2527_p2  ;;  %p2548_p3 = por %p2547_p1, %p2546_p7 }
  0x33   : > { %p2542_p9 = pneg %p2541_p12 }
  0x35   : > { %p2549_p11 = pnand %p2548_p3, %p2542_p9 }
  0x37   : > { %2552 = shalt.err (!%p2549_p11)
}
  0x38   : > { %s2741_s9 = smov 64   ;;  %s2742_s10 = smov 4  }
  0x39   : > { %2361 = dma.hbm_to_vmem [thread:$0]  (!%p2861_p13), %s3555_s1, 5120, %s148_s5, [#allocation6], %s2741_s9, %s2741_s9, %s2742_s10  }
  0x3a   : > { %s3556_s2 = sld [smem:[#allocation18_spill]] }
  0x40   : > { %s2553_s4 = scalar_lea.hbm %s3556_s2, 2240 }
  0x41   : > { %p2554_p0 = scmp.ne.s32.totalorder %s3556_s2, %s2553_s4  ;;  %p2560_p7 = scmp.lt.u32.totalorder %s2553_s4, %s3556_s2 }
  0x43   : > { %p2556_p1 = pnand %p2554_p0, %p2527_p2 }
  0x45   : > { %p2557_p3 = pneg %p2556_p1 }
  0x47   : > { %p2562_p9 = pnand %p2560_p7, %p2557_p3 }
  0x49   : > { %2565 = shalt.err (!%p2562_p9)
}
  0x4a   : > { %s2566_s5 = scalar_lea.vmem %s2865_s8, 2240  ;;  %p2574_p6 = scmp.lt.s32.totalorder %s2865_s8, %s2865_s8 }
  0x4b   : > { %p2567_p11 = scmp.ne.s32.totalorder %s2865_s8, %s2566_s5  ;;  %p2575_p8 = scmp.lt.s32.totalorder %s2566_s5, %s2566_s5 }
  0x4d   : > { %p2569_p4 = pnand %p2567_p11, %p2527_p2  ;;  %p2576_p10 = por %p2575_p8, %p2574_p6 }
  0x4f   : > { %p2570_p5 = pneg %p2569_p4 }
  0x51   : > { %p2577_p12 = pnand %p2576_p10, %p2570_p5 }
  0x53   : > { %2580 = shalt.err (!%p2577_p12)
}
  0x54   : > { %s2743_s12 = smov 320   ;;  %s2744_s26 = smov 20  }
  0x55   : > { %2364 = dma.hbm_to_vmem [thread:$0]  (!%p2861_p13), %s3556_s2, 2240, %s2865_s8, [#allocation6], %s2743_s12, %s2743_s12, %s2744_s26  }
  0x56   : > { %s29_s10 = sadd.s32 1, %s2729_s20  ;;  %s32_s11 = sadd.s32 1, %s2733_s21 }
  0x57   : > { %p30_p2 = scmp.ge.s32.totalorder %s29_s10, 2  ;;  %s36_s15 = ssub.s32 2, %s2733_s21 }
  0x58   : > { %s41_s23 = sadd.s32 1, %s2717_s17  ;;  %p48_p0 = scmp.ne.s32.totalorder %s2717_s17, %s2713_s16 }
  0x59   : > { %s3583_s10 = smov (%p30_p2, %s29_s10), 0  ;;  %s3585_s11 = smov (!%p30_p2, %s32_s11), %s2733_s21 }
  0x5a   : > { %3557 = sst [smem:[#allocation15_spill]] %s3583_s10  ;;  %p49_p1 = scmp.eq.s32.totalorder %s2737_s22, 0 }
  0x5b   : > { %s107_s6 = ssub.s32 %s2729_s20, %s3583_s10  ;;  %p34_p3 = scmp.ge.s32.totalorder %s3585_s11, 3 }
  0x5c   : > { %p2375_p7 = scmp.lt.s32.totalorder %s2737_s22, 6  ;;  %p2927_p9 = por %p49_p1, %p48_p0 }
  0x5d   : > { %s174_s24 = sand.u32 1, %s2717_s17   ;;  %s3587_s11 = smov (%p34_p3, %s3585_s11), 0 }
  0x5e   : > { %3559 = sst [smem:[#allocation16_spill]] %s3587_s11  ;;  %s2340_s4 = smul.u32 10, %s174_s24 }
  0x5f   : > { %s37_s7 = ssub.s32 2, %s3587_s11  ;;  %s106_s5 = ssub.s32 %s2733_s21, %s3587_s11 }
  0x60   : > { %s38_s12 = ssub.s32 %s36_s15, %s37_s7  ;;  %s108_s26 = sor.u32 %s107_s6, %s106_s5 }
  0x61   : > { %p39_p13 = scmp.eq.s32.totalorder %s38_s12, 0  ;;  %p109_p11 = scmp.eq.s32.totalorder %s108_s26, 0 }
  0x62   : > { %s2341_s29 = smul.u32 160, %s36_s15  ;;  %s3560_s1 = sadd.s32 1, %s2705_s14 }
  0x63   : > { %s2938_s9 = scalar_select %p39_p13, %s2717_s17, %s41_s23  }
  0x64   : > { %s2943_s2 = scalar_select %p109_p11, %s2705_s14, %s3560_s1  }
  0x65   : > { %s2948_s3 = scalar_lea.hbm %s3528_s0, %s2341_s29  ;;  %s178_s11 = scalar_lea.vmem [#allocation2], %s2340_s4 }
  0x66   : > { %s186_s7 = sshll.u32 %s178_s11, 4  ;;  %p2956_p4 = pnand %p2375_p7, %p2927_p9  ;;  %s2950_s7 = int_to_ptr.vmem [resolvable:$true] %s186_s7 }
  0x67   : > { %s2960_s1 = scalar_lea.sflag [#allocation3], %s174_s24  ;;  %s2581_s20 = scalar_lea.hbm %s2948_s3, 160 }
  0x68   : > { %p2582_p5 = scmp.ne.s32.totalorder %s2948_s3, %s2581_s20  ;;  %p2583_p6 = pneg %p2956_p4 }
  0x69   : > { %s2586_s23 = scalar_lea.hbm %s3528_s0, 480  ;;  %p2587_p12 = scmp.lt.u32.totalorder %s2948_s3, %s3528_s0 }
  0x6a   : > { %p2584_p8 = pnand %p2583_p6, %p2582_p5  ;;  %p2588_p2 = scmp.lt.u32.totalorder %s2586_s23, %s2581_s20 }
  0x6b   : > { %p2590_p1 = scmp.lt.u32.totalorder %s2581_s20, %s2948_s3 }
  0x6c   : > { %p2585_p10 = pneg %p2584_p8  ;;  %p2589_p0 = por %p2588_p2, %p2587_p12 }
  0x6e   : > { %p2591_p3 = por %p2590_p1, %p2589_p0 }
  0x70   : > { %p2592_p7 = pnand %p2591_p3, %p2585_p10 }
  0x72   : > { %2595 = shalt.err (!%p2592_p7)
}
  0x73   : > { %s2596_s24 = scalar_lea.vmem %s2950_s7, 160  ;;  %s2745_s4 = smov [#allocation2]  }
  0x74   : > { %p2597_p9 = scmp.ne.s32.totalorder %s2950_s7, %s2596_s24  ;;  %s2601_s5 = sshll.u32 %s2745_s4, 4  ;;  %s2602_s5 = int_to_ptr.vmem [resolvable:$false] %s2601_s5 }
  0x75   : > { %s2603_s12 = scalar_lea.vmem %s2602_s5, 320  ;;  %p2604_p5 = scmp.lt.s32.totalorder %s2950_s7, %s2602_s5 }
  0x76   : > { %p2599_p13 = pnand %p2597_p9, %p2583_p6  ;;  %p2605_p8 = scmp.lt.s32.totalorder %s2603_s12, %s2596_s24 }
  0x78   : > { %p2600_p11 = pneg %p2599_p13  ;;  %p2606_p12 = por %p2605_p8, %p2604_p5 }
  0x7a   : > { %p2607_p2 = pnand %p2606_p12, %p2600_p11 }
  0x7c   : > { %2610 = shalt.err (!%p2607_p2)
}
  0x7d   : > { %s2746_s26 = smov 32   ;;  %s2747_s29 = smov 2  }
  0x7e   : > { %2368 = dma.hbm_to_vmem [thread:$0]  (!%p2956_p4), %s2948_s3, 160, %s2950_s7, %s2960_s1, %s2746_s26, %s2746_s26, %s2747_s29  }
  0x7f   : > { %p3562_p6 = scmp.ne.s32.totalorder %s3553_s30, 0 }
  0x80   : > { %s200_s20 = sand.u32 (!%p3562_p6), 1, %s2713_s16   ;;  %p3563_p10 = scmp.ne.s32.totalorder (!%p3562_p6), %s3549_s27, 0 }
  0x81   : > { %198 = sbr.rel (%p3562_p6) target bundleno = 839 (0x347), region = 32  ;;  %s201_s11 = scalar_lea.sflag (!%p3562_p6), [#allocation3], %s200_s20 }
  0x82   : > { %s2342_s10 = smul.u32 (!%p3562_p6), 10, %s200_s20 }
  0x84   : > { %s204_s23 = scalar_lea.vmem (!%p3562_p6), [#allocation2], %s2342_s10 }
  0x88   : > { %2684 = dma.done.wait (%p3563_p10), %s201_s11, 160  }
  0x89   : > { %2686 = vsyncadd (%p3563_p10), %s201_s11, 4294967136  ;;  %p3564_p0 = scmp.ne.s32.totalorder %s3548_s25, 0 }
  0x8b   : > { %2688 = dma.done.wait (%p3564_p0), [#allocation6], 7360  }
  0x8c   : > { %2690 = vsyncadd (%p3564_p0), [#allocation6], 4294959936  ;;  %s248_s3 = smul.u32 320, %s2721_s18  ;;  %vm408_vm0 = vcmask 326656   ;;  %v238_v0 = vld [vmem:[%s204_s23] sm:$0x3] }
  0x8d   : > { %v239_v1 = vld [vmem:[%s204_s23 + $0x2] sm:$0x3]  ;;  %v240_v2 = vld [vmem:[%s204_s23 + $0x4] sm:$0x3]  ;;  %v243_v3 = vunpack.c.l.u8.bf16 %v238_v0  ;;  %v241_v5 = vld [vmem:[%s204_s23 + $0x6] sm:$0x3] }
  0x8e   : > { %s249_s30 = sshra.s32 %s248_s3, 3  ;;  %v244_v4 = vunpack.c.l.u8.bf16 %v239_v1  ;;  %v245_v6 = vunpack.c.l.u8.bf16 %v240_v2  ;;  %v242_v7 = vld [vmem:[%s204_s23 + $0x8] sm:$0x3]  ;;  %v246_v8 = vunpack.c.l.u8.bf16 %v241_v5  ;;  %vm469_vm1 = vcmask 1043456   ;;  %v2499_v19 = vld [vmem:[#allocation7 + $0x4] ss:$20 sps:$4 sm:$0xff]  }
  0x8f   : > { %s2068_s7 = sshll.u32 %s249_s30, 2  ;;  %v247_v11 = vunpack.c.l.u8.bf16 %v242_v7  ;;  %v2501_v20 = vld [vmem:[#allocation7] ss:$20 sps:$4 sm:$0xff]   ;;  %v2502_v21 = vld [vmem:[#allocation7 + $0x8] ss:$20 sps:$4 sm:$0xff]   ;;  %874 = vmatprep.subr.bf16.mxu1 %v2499_v19  ;;  %v2748_v55 = vmov 0  }
  0x90   : > { %s3000_s27 = scalar_lea.vmem [#allocation5], %s2068_s7  ;;  %v2089_v10 = vcombine.low %v243_v3, %v244_v4  ;;  %v2090_v12 = vcombine.low %v245_v6, %v246_v8  ;;  %v2504_v22 = vld [vmem:[#allocation7 + $0xc] ss:$20 sps:$4 sm:$0xff]   ;;  %875 = vmatpush1.bf16.msra.mxu1 %v2501_v20  ;;  %v2507_v24 = vld [vmem:[#allocation7 + $0x28] ss:$20 sps:$4 sm:$0xff]   ;;  %906 = vmatprep.mubr.bf16.mxu1 %v2748_v55  ;;  %vm798_vm2 = vcmask 457728  }
  0x91   : > { %v2479_v9 = vld [vmem:[%s3000_s27] sm:$0xff]   ;;  %v2091_v13 = vcombine.low %v247_v11, %v247_v11  ;;  %v2480_v15 = vld [vmem:[%s3000_s27 + $0x8] sm:$0xff]   ;;  %v2481_v16 = vld [vmem:[%s3000_s27 + $0x10] sm:$0xff]   ;;  %s232_s25 = sand.u32 1, %s2701_s13   ;;  %s2378_s6 = smul.u32 200, %s2721_s18 }
  0x92   : > { %2250 = vmatprep.mubr.msk.bf16.mxu0 %vm408_vm0, %v2479_v9  ;;  %2244 = vmatprep.subr.bf16.mxu0 %v2089_v10  ;;  %v2482_v17 = vld [vmem:[%s3000_s27 + $0x18] sm:$0xff]   ;;  %v2483_v18 = vld [vmem:[%s3000_s27 + $0x20] sm:$0xff]   ;;  %v2484_v27 = vld [vmem:[%s3000_s27 + $0x28] sm:$0xff]   ;;  %s2343_s15 = smul.u32 1600, %s232_s25  ;;  %s3565_s12 = sld [smem:[#allocation19_spill]] }
  0x93   : > { %2245 = vmatpush3.bf16.msra.mxu0 %v2089_v10  ;;  %v471_v14 = vsel %vm469_vm1, %v2091_v13, 0  ;;  %v2505_v23 = vld [vmem:[#allocation7 + $0x2c] ss:$20 sps:$4 sm:$0xff]   ;;  %v2508_v25 = vld [vmem:[#allocation7 + $0x30] ss:$20 sps:$4 sm:$0xff]   ;;  %v2488_v35 = vld [vmem:[%s3000_s27 + $0x48] sm:$0xff]  }
  0x94   : > { %2246 = vmatprep.subr.bf16.mxu0 %v2090_v12  ;;  %v2510_v26 = vld [vmem:[#allocation7 + $0x34] ss:$20 sps:$4 sm:$0xff]   ;;  %876 = vmatprep.subr.bf16.mxu1 %v2505_v23  ;;  %v2485_v29 = vld [vmem:[%s3000_s27 + $0x30] sm:$0xff]   ;;  %v2513_v30 = vld [vmem:[#allocation7 + $0x50] ss:$20 sps:$4 sm:$0xff]   ;;  %s3243_s1 = scalar_lea.vmem [#allocation8], %s2343_s15 }
  0x95   : > { %v2511_v28 = vld [vmem:[#allocation7 + $0x54] ss:$20 sps:$4 sm:$0xff]   ;;  %877 = vmatpush1.bf16.msra.mxu1 %v2507_v24  ;;  %v2514_v31 = vld [vmem:[#allocation7 + $0x58] ss:$20 sps:$4 sm:$0xff]   ;;  %v2516_v32 = vld [vmem:[#allocation7 + $0x5c] ss:$20 sps:$4 sm:$0xff]  }
  0x96   : > { %878 = vmatprep.subr.bf16.mxu1 %v2511_v28  ;;  %v2486_v33 = vld [vmem:[%s3000_s27 + $0x38] sm:$0xff]   ;;  %v2487_v34 = vld [vmem:[%s3000_s27 + $0x40] sm:$0xff]   ;;  %v2489_v36 = vld [vmem:[%s3000_s27 + $0x50] sm:$0xff]   ;;  %s2345_s8 = smul.u32 400, %s2725_s19  ;;  %s1950_s4 = sshll.u32 %s3243_s1, 4  ;;  %s3455_s4 = int_to_ptr.vmem [resolvable:$true] %s1950_s4 }
  0x97   : > { %2247 = vmatpush3.bf16.msra.mxu0 %v2090_v12  ;;  %v2490_v37 = vld [vmem:[%s3000_s27 + $0x58] sm:$0xff]   ;;  %v2491_v38 = vld [vmem:[%s3000_s27 + $0x60] sm:$0xff]   ;;  %v2492_v39 = vld [vmem:[%s3000_s27 + $0x68] sm:$0xff]   ;;  %s3467_s20 = scalar_lea.sflag [#allocation4], %s232_s25  ;;  %s2611_s10 = scalar_lea.vmem %s3455_s4, 25600 }
  0x98   : > { %2338 = vmatprep.subr.msk.bf16.mxu0 %vm469_vm1, %v2091_v13  ;;  %v2493_v40 = vld [vmem:[%s3000_s27 + $0x70] sm:$0xff]   ;;  %v2494_v41 = vld [vmem:[%s3000_s27 + $0x78] sm:$0xff]   ;;  %v2495_v42 = vld [vmem:[%s3000_s27 + $0x80] sm:$0xff]   ;;  %s1947_s24 = sadd.s32 %s2378_s6, %s2345_s8  ;;  %s3566_s26 = smov %s3565_s12 }
  0x99   : > { %879 = vmatpush1.bf16.msra.mxu1 %v2513_v30  ;;  %v2496_v43 = vld [vmem:[%s3000_s27 + $0x88] sm:$0xff]   ;;  %v2497_v44 = vld [vmem:[%s3000_s27 + $0x90] sm:$0xff]   ;;  %v2498_v45 = vld [vmem:[%s3000_s27 + $0x98] sm:$0xff]   ;;  %s2194_s18 = sshll.u32 %s1947_s24, 7  ;;  %p2612_p4 = scmp.ne.s32.totalorder %s3455_s4, %s2611_s10 }
  0x9a   : > { %v704_v46 = vld [vmem:[#allocation7 + $0x78] sm:$0xff]  ;;  %v705_v47 = vld [vmem:[#allocation7 + $0x80] sm:$0xff]  ;;  %v2524_v6 = vld [vmem:[#allocation7 + $0x88] ss:$0 sps:$4 sm:$0xff]   ;;  %s3461_s29 = scalar_lea.hbm %s3565_s12, %s2194_s18  ;;  %p3567_p1 = scmp.ne.s32.totalorder %s3550_s28, 0 }
  0x9b   : > { %2249 = vmatpush3.bf16.msra.mxu0 %v471_v14  ;;  %v2128_v48 = vcombine.high %v704_v46, %v704_v46  ;;  %v2127_v49 = vcombine.low %v704_v46, %v704_v46  ;;  %v2130_v50 = vcombine.high %v705_v47, %v705_v47  ;;  %v2129_v51 = vcombine.low %v705_v47, %v705_v47  ;;  %v2521_v54 = vld [vmem:[#allocation7 + $0x10] ss:$20 sps:$4 sm:$0xff]   ;;  %v2522_v62 = vld [vmem:[#allocation7 + $0x38] ss:$20 sps:$4 sm:$0xff]   ;;  %v2523_v0 = vld [vmem:[#allocation7 + $0x60] ss:$20 sps:$4 sm:$0xff]  }
  0x9c   : > { %1107 = vmatprep.subr.bf16.mxu0 %v2504_v22  ;;  %v872_v9 = vsel %vm469_vm1, %v2524_v6, 0  ;;  %p2613_p3 = pnand %p2612_p4, %p3567_p1  ;;  %s2749_s11 = smov [#allocation8]  }
  0x9d   : > { %2132 = vmatprep.subr.msk.bf16.mxu1 %vm469_vm1, %v2128_v48  ;;  %v860_v52 = vsel %vm469_vm1, %v2127_v49, 0  ;;  %v866_v53 = vsel %vm469_vm1, %v2129_v51, 0  ;;  %s2615_s23 = sshll.u32 %s2749_s11, 4  ;;  %s2616_s23 = int_to_ptr.vmem [resolvable:$false] %s2615_s23 }
  0x9e   : > { %2251 = vmatmul.mubr.msk.bf16.vlgmr.msra.gmra.mrb[0].mxu0 %vm408_vm0, %v2480_v15  ;;  %881 = vmatpush1.bf16.msra.mxu1 %v860_v52  ;;  %p2614_p7 = pneg %p2613_p3  ;;  %s2617_s3 = scalar_lea.vmem %s2616_s23, 51200 }
  0x9f   : > { %2254 = vmatprep.mubr.msk.bf16.mxu0 %vm408_vm0, %v2481_v16  ;;  %1108 = vmatpush1.bf16.msra.mxu0 %v2502_v21  ;;  %p2618_p9 = scmp.lt.s32.totalorder %s3455_s4, %s2616_s23  ;;  %p2619_p13 = scmp.lt.s32.totalorder %s2617_s3, %s2611_s10 }
  0xa0   : > { %1109 = vmatprep.subr.bf16.mxu0 %v2510_v26  ;;  %2290 = vmatprep.subr.bf16.mxu1 %v2521_v54 }
  0xa1   : > { %p2620_p11 = por %p2619_p13, %p2618_p9 }
  0xa3   : > { %1110 = vmatpush1.bf16.msra.mxu0 %v2508_v25  ;;  %p2621_p5 = pnand %p2620_p11, %p2614_p7 }
  0xa4   : > { %1111 = vmatprep.subr.bf16.mxu0 %v2516_v32 }
  0xa6   : > { %2255 = vmatmul.mubr.msk.bf16.gmra.mrb[4].mxu0 %vm408_vm0, %v2482_v17 }
  0xa7   : > { %2258 = vmatprep.mubr.msk.bf16.mxu0 %vm408_vm0, %v2483_v18  ;;  %1112 = vmatpush1.bf16.msra.mxu0 %v2514_v31 }
  0xa8   : > { %2153 = vmatprep.subr.msk.bf16.mxu0 %vm469_vm1, %v2130_v50 }
  0xab   : > { %1114 = vmatpush1.bf16.msra.mxu0 %v866_v53 }
  0xae   : > { %2259 = vmatmul.mubr.msk.bf16.gmra.mrb[8].mxu0 %vm408_vm0, %v2484_v27 }
  0xaf   : > { %2262 = vmatprep.mubr.msk.bf16.mxu0 %vm408_vm0, %v2485_v29 }
  0xb6   : > { %2263 = vmatmul.mubr.msk.bf16.gmra.mrb[12].mxu0 %vm408_vm0, %v2486_v33 }
  0xb7   : > { %2266 = vmatprep.mubr.msk.bf16.mxu0 %vm408_vm0, %v2487_v34 }
  0xbe   : > { %2267 = vmatmul.mubr.msk.bf16.gmra.mrb[16].mxu0 %vm408_vm0, %v2488_v35 }
  0xbf   : > { %2270 = vmatprep.mubr.msk.bf16.mxu0 %vm408_vm0, %v2489_v36 }
  0xc6   : > { %2271 = vmatmul.mubr.msk.bf16.gmra.mrb[20].mxu0 %vm408_vm0, %v2490_v37 }
  0xc7   : > { %2274 = vmatprep.mubr.msk.bf16.mxu0 %vm408_vm0, %v2491_v38 }
  0xce   : > { %2275 = vmatmul.mubr.msk.bf16.gmra.mrb[24].mxu0 %vm408_vm0, %v2492_v39 }
  0xcf   : > { %2278 = vmatprep.mubr.msk.bf16.mxu0 %vm408_vm0, %v2493_v40 }
  0xd6   : > { %2279 = vmatmul.mubr.msk.bf16.gmra.mrb[28].mxu0 %vm408_vm0, %v2494_v41 }
  0xd7   : > { %2282 = vmatprep.mubr.msk.bf16.mxu0 %vm408_vm0, %v2495_v42 }
  0xde   : > { %2283 = vmatmul.mubr.msk.bf16.gmra.mrb[32].mxu0 %vm408_vm0, %v2496_v43 }
  0xdf   : > { %2286 = vmatprep.mubr.msk.bf16.mxu0 %vm408_vm0, %v2497_v44 }
  0xe6   : > { %2287 = vmatmul.mubr.msk.bf16.gmra.mrb[36].mxu0 %vm408_vm0, %v2498_v45 }
  0xe7   : > { %1139 = vmatprep.mubr.bf16.mxu0 %v2748_v55 }
 0x171   : > { %v2252_v56 = vpop.f32.mrb[0].mxu0 }
 0x172   : > { %v507_v57 = vpop.f32.mrb[1].mxu0 }
 0x173   : > { %v2253_v58 = vpop.f32.mrb[2].mxu0 }
 0x174   : > { %v3050_v59 = vpack.c.bf16 %v2253_v58, %v2252_v56  ;;  %v510_v60 = vpop.f32.mrb[3].mxu0 }
 0x175   : > { %v3052_v61 = vpack.c.bf16 %v510_v60, %v507_v57 }
 0x177   : > { %2133 = vmatmul.mubr.msk.bf16.vlgmr.msra.gmra.mrb[0].mxu1 %vm798_vm2, %v3052_v61  ;;  %2154 = vmatmul.mubr.msk.bf16.vlgmr.msra.gmra.mrb[40].mxu0 %vm798_vm2, %v3052_v61 }
 0x178   : > { %2291 = vmatpush3.bf16.msra.mxu1 %v2521_v54  ;;  %916 = vmatprep.mubr.bf16.mxu1 %v2748_v55 }
 0x179   : > { %v2256_v63 = vpop.f32.mrb[4].mxu0  ;;  %1149 = vmatprep.mubr.bf16.mxu0 %v2748_v55  ;;  %2292 = vmatprep.subr.bf16.mxu1 %v2522_v62 }
 0x17a   : > { %v523_v1 = vpop.f32.mrb[5].mxu0 }
 0x17b   : > { %v2257_v2 = vpop.f32.mrb[6].mxu0 }
 0x17c   : > { %v3060_v3 = vpack.c.bf16 %v2257_v2, %v2256_v63  ;;  %v526_v4 = vpop.f32.mrb[7].mxu0  ;;  %2293 = vmatpush3.bf16.msra.mxu1 %v2522_v62 }
 0x17d   : > { %v3062_v5 = vpack.c.bf16 %v526_v4, %v523_v1  ;;  %2294 = vmatprep.subr.bf16.mxu1 %v2523_v0 }
 0x17f   : > { %2134 = vmatmul.mubr.msk.bf16.gmra.mrb[4].mxu1 %vm798_vm2, %v3050_v59  ;;  %2155 = vmatmul.mubr.msk.bf16.gmra.mrb[44].mxu0 %vm798_vm2, %v3050_v59 }
 0x180   : > { %926 = vmatprep.mubr.bf16.mxu1 %v2748_v55  ;;  %1159 = vmatprep.mubr.bf16.mxu0 %v2748_v55 }
 0x181   : > { %v2260_v7 = vpop.f32.mrb[8].mxu0  ;;  %2295 = vmatpush3.bf16.msra.mxu1 %v2523_v0 }
 0x182   : > { %v539_v8 = vpop.f32.mrb[9].mxu0  ;;  %2339 = vmatprep.subr.msk.bf16.mxu1 %vm469_vm1, %v2524_v6 }
 0x183   : > { %v2261_v10 = vpop.f32.mrb[10].mxu0 }
 0x184   : > { %v3072_v11 = vpack.c.bf16 %v2261_v10, %v2260_v7  ;;  %v542_v12 = vpop.f32.mrb[11].mxu0 }
 0x185   : > { %v3074_v13 = vpack.c.bf16 %v542_v12, %v539_v8  ;;  %2297 = vmatpush3.bf16.msra.mxu1 %v872_v9 }
 0x187   : > { %2135 = vmatmul.mubr.msk.bf16.gmra.mrb[8].mxu1 %vm798_vm2, %v3062_v5  ;;  %2156 = vmatmul.mubr.msk.bf16.gmra.mrb[48].mxu0 %vm798_vm2, %v3062_v5 }
 0x188   : > { %936 = vmatprep.mubr.bf16.mxu1 %v2748_v55  ;;  %1169 = vmatprep.mubr.bf16.mxu0 %v2748_v55 }
 0x189   : > { %v2264_v14 = vpop.f32.mrb[12].mxu0 }
 0x18a   : > { %v555_v15 = vpop.f32.mrb[13].mxu0 }
 0x18b   : > { %v2265_v16 = vpop.f32.mrb[14].mxu0 }
 0x18c   : > { %v3082_v17 = vpack.c.bf16 %v2265_v16, %v2264_v14  ;;  %v558_v18 = vpop.f32.mrb[15].mxu0 }
 0x18d   : > { %v3084_v19 = vpack.c.bf16 %v558_v18, %v555_v15 }
 0x18f   : > { %2136 = vmatmul.mubr.msk.bf16.gmra.mrb[12].mxu1 %vm798_vm2, %v3060_v3  ;;  %2157 = vmatmul.mubr.msk.bf16.gmra.mrb[52].mxu0 %vm798_vm2, %v3060_v3 }
 0x190   : > { %946 = vmatprep.mubr.bf16.mxu1 %v2748_v55  ;;  %1179 = vmatprep.mubr.bf16.mxu0 %v2748_v55 }
 0x191   : > { %v2268_v20 = vpop.f32.mrb[16].mxu0 }
 0x192   : > { %v571_v21 = vpop.f32.mrb[17].mxu0 }
 0x193   : > { %v2269_v22 = vpop.f32.mrb[18].mxu0 }
 0x194   : > { %v3092_v23 = vpack.c.bf16 %v2269_v22, %v2268_v20  ;;  %v574_v24 = vpop.f32.mrb[19].mxu0 }
 0x195   : > { %v3094_v25 = vpack.c.bf16 %v574_v24, %v571_v21 }
 0x197   : > { %2137 = vmatmul.mubr.msk.bf16.gmra.mrb[16].mxu1 %vm798_vm2, %v3074_v13  ;;  %2158 = vmatmul.mubr.msk.bf16.gmra.mrb[56].mxu0 %vm798_vm2, %v3074_v13 }
 0x198   : > { %956 = vmatprep.mubr.bf16.mxu1 %v2748_v55  ;;  %1189 = vmatprep.mubr.bf16.mxu0 %v2748_v55 }
 0x199   : > { %v2272_v26 = vpop.f32.mrb[20].mxu0 }
 0x19a   : > { %v587_v27 = vpop.f32.mrb[21].mxu0 }
 0x19b   : > { %v2273_v28 = vpop.f32.mrb[22].mxu0 }
 0x19c   : > { %v3102_v29 = vpack.c.bf16 %v2273_v28, %v2272_v26  ;;  %v590_v30 = vpop.f32.mrb[23].mxu0 }
 0x19d   : > { %v3104_v31 = vpack.c.bf16 %v590_v30, %v587_v27 }
 0x19f   : > { %2138 = vmatmul.mubr.msk.bf16.gmra.mrb[20].mxu1 %vm798_vm2, %v3072_v11  ;;  %2159 = vmatmul.mubr.msk.bf16.gmra.mrb[60].mxu0 %vm798_vm2, %v3072_v11 }
 0x1a0   : > { %966 = vmatprep.mubr.bf16.mxu1 %v2748_v55  ;;  %1199 = vmatprep.mubr.bf16.mxu0 %v2748_v55 }
 0x1a1   : > { %v2276_v32 = vpop.f32.mrb[24].mxu0 }
 0x1a2   : > { %v603_v33 = vpop.f32.mrb[25].mxu0 }
 0x1a3   : > { %v2277_v34 = vpop.f32.mrb[26].mxu0 }
 0x1a4   : > { %v3112_v35 = vpack.c.bf16 %v2277_v34, %v2276_v32  ;;  %v606_v36 = vpop.f32.mrb[27].mxu0 }
 0x1a5   : > { %v3114_v37 = vpack.c.bf16 %v606_v36, %v603_v33 }
 0x1a7   : > { %2139 = vmatmul.mubr.msk.bf16.gmra.mrb[24].mxu1 %vm798_vm2, %v3084_v19  ;;  %2160 = vmatmul.mubr.msk.bf16.gmra.mrb[64].mxu0 %vm798_vm2, %v3084_v19 }
 0x1a8   : > { %976 = vmatprep.mubr.bf16.mxu1 %v2748_v55  ;;  %1209 = vmatprep.mubr.bf16.mxu0 %v2748_v55 }
 0x1a9   : > { %v2280_v38 = vpop.f32.mrb[28].mxu0 }
 0x1aa   : > { %v619_v39 = vpop.f32.mrb[29].mxu0 }
 0x1ab   : > { %v2281_v40 = vpop.f32.mrb[30].mxu0 }
 0x1ac   : > { %v3122_v41 = vpack.c.bf16 %v2281_v40, %v2280_v38  ;;  %v622_v42 = vpop.f32.mrb[31].mxu0 }
 0x1ad   : > { %v3124_v43 = vpack.c.bf16 %v622_v42, %v619_v39 }
 0x1af   : > { %2140 = vmatmul.mubr.msk.bf16.gmra.mrb[28].mxu1 %vm798_vm2, %v3082_v17  ;;  %2161 = vmatmul.mubr.msk.bf16.gmra.mrb[68].mxu0 %vm798_vm2, %v3082_v17 }
 0x1b0   : > { %986 = vmatprep.mubr.bf16.mxu1 %v2748_v55  ;;  %1219 = vmatprep.mubr.bf16.mxu0 %v2748_v55 }
 0x1b1   : > { %v2284_v44 = vpop.f32.mrb[32].mxu0 }
 0x1b2   : > { %v635_v45 = vpop.f32.mrb[33].mxu0 }
 0x1b3   : > { %v2285_v46 = vpop.f32.mrb[34].mxu0 }
 0x1b4   : > { %v3132_v47 = vpack.c.bf16 %v2285_v46, %v2284_v44  ;;  %v638_v48 = vpop.f32.mrb[35].mxu0 }
 0x1b5   : > { %v3134_v49 = vpack.c.bf16 %v638_v48, %v635_v45 }
 0x1b7   : > { %2141 = vmatmul.mubr.msk.bf16.gmra.mrb[32].mxu1 %vm798_vm2, %v3094_v25  ;;  %2162 = vmatmul.mubr.msk.bf16.gmra.mrb[72].mxu0 %vm798_vm2, %v3094_v25 }
 0x1b8   : > { %996 = vmatprep.mubr.bf16.mxu1 %v2748_v55  ;;  %1229 = vmatprep.mubr.bf16.mxu0 %v2748_v55 }
 0x1b9   : > { %v2288_v50 = vpop.f32.mrb[36].mxu0 }
 0x1ba   : > { %v651_v51 = vpop.f32.mrb[37].mxu0 }
 0x1bb   : > { %v2289_v52 = vpop.f32.mrb[38].mxu0 }
 0x1bc   : > { %v3142_v53 = vpack.c.bf16 %v2289_v52, %v2288_v50  ;;  %v654_v54 = vpop.f32.mrb[39].mxu0 }
 0x1bd   : > { %v3144_v56 = vpack.c.bf16 %v654_v54, %v651_v51 }
 0x1bf   : > { %2142 = vmatmul.mubr.msk.bf16.gmra.mrb[36].mxu1 %vm798_vm2, %v3092_v23  ;;  %2163 = vmatmul.mubr.msk.bf16.gmra.mrb[76].mxu0 %vm798_vm2, %v3092_v23 }
 0x1c0   : > { %1006 = vmatprep.mubr.bf16.mxu1 %v2748_v55  ;;  %1239 = vmatprep.mubr.bf16.mxu0 %v2748_v55 }
 0x1c7   : > { %2143 = vmatmul.mubr.msk.bf16.gmra.mrb[40].mxu1 %vm798_vm2, %v3104_v31  ;;  %2164 = vmatmul.mubr.msk.bf16.gmra.mrb[80].mxu0 %vm798_vm2, %v3104_v31 }
 0x1c8   : > { %1016 = vmatprep.mubr.bf16.mxu1 %v2748_v55  ;;  %1249 = vmatprep.mubr.bf16.mxu0 %v2748_v55 }
 0x1cf   : > { %2144 = vmatmul.mubr.msk.bf16.gmra.mrb[44].mxu1 %vm798_vm2, %v3102_v29  ;;  %2165 = vmatmul.mubr.msk.bf16.gmra.mrb[84].mxu0 %vm798_vm2, %v3102_v29 }
 0x1d0   : > { %1026 = vmatprep.mubr.bf16.mxu1 %v2748_v55  ;;  %1259 = vmatprep.mubr.bf16.mxu0 %v2748_v55 }
 0x1d7   : > { %2145 = vmatmul.mubr.msk.bf16.gmra.mrb[48].mxu1 %vm798_vm2, %v3114_v37  ;;  %2166 = vmatmul.mubr.msk.bf16.gmra.mrb[88].mxu0 %vm798_vm2, %v3114_v37 }
 0x1d8   : > { %1036 = vmatprep.mubr.bf16.mxu1 %v2748_v55  ;;  %1269 = vmatprep.mubr.bf16.mxu0 %v2748_v55 }
 0x1df   : > { %2146 = vmatmul.mubr.msk.bf16.gmra.mrb[52].mxu1 %vm798_vm2, %v3112_v35  ;;  %2167 = vmatmul.mubr.msk.bf16.gmra.mrb[92].mxu0 %vm798_vm2, %v3112_v35 }
 0x1e0   : > { %1046 = vmatprep.mubr.bf16.mxu1 %v2748_v55  ;;  %1279 = vmatprep.mubr.bf16.mxu0 %v2748_v55 }
 0x1e7   : > { %2147 = vmatmul.mubr.msk.bf16.gmra.mrb[56].mxu1 %vm798_vm2, %v3124_v43  ;;  %2168 = vmatmul.mubr.msk.bf16.gmra.mrb[96].mxu0 %vm798_vm2, %v3124_v43 }
 0x1e8   : > { %1056 = vmatprep.mubr.bf16.mxu1 %v2748_v55  ;;  %1289 = vmatprep.mubr.bf16.mxu0 %v2748_v55 }
 0x1ef   : > { %2148 = vmatmul.mubr.msk.bf16.gmra.mrb[60].mxu1 %vm798_vm2, %v3122_v41  ;;  %2169 = vmatmul.mubr.msk.bf16.gmra.mrb[100].mxu0 %vm798_vm2, %v3122_v41 }
 0x1f0   : > { %1066 = vmatprep.mubr.bf16.mxu1 %v2748_v55  ;;  %1299 = vmatprep.mubr.bf16.mxu0 %v2748_v55 }
 0x1f7   : > { %2149 = vmatmul.mubr.msk.bf16.gmra.mrb[64].mxu1 %vm798_vm2, %v3134_v49  ;;  %2170 = vmatmul.mubr.msk.bf16.gmra.mrb[104].mxu0 %vm798_vm2, %v3134_v49 }
 0x1f8   : > { %1076 = vmatprep.mubr.bf16.mxu1 %v2748_v55  ;;  %1309 = vmatprep.mubr.bf16.mxu0 %v2748_v55 }
 0x1ff   : > { %2150 = vmatmul.mubr.msk.bf16.gmra.mrb[68].mxu1 %vm798_vm2, %v3132_v47  ;;  %2171 = vmatmul.mubr.msk.bf16.gmra.mrb[108].mxu0 %vm798_vm2, %v3132_v47 }
 0x200   : > { %1086 = vmatprep.mubr.bf16.mxu1 %v2748_v55  ;;  %1319 = vmatprep.mubr.bf16.mxu0 %v2748_v55 }
 0x207   : > { %2151 = vmatmul.mubr.msk.bf16.gmra.mrb[72].mxu1 %vm798_vm2, %v3144_v56  ;;  %2172 = vmatmul.mubr.msk.bf16.gmra.mrb[112].mxu0 %vm798_vm2, %v3144_v56 }
 0x208   : > { %1096 = vmatprep.mubr.bf16.mxu1 %v2748_v55  ;;  %1329 = vmatprep.mubr.bf16.mxu0 %v2748_v55 }
 0x20f   : > { %2152 = vmatmul.mubr.msk.bf16.gmra.mrb[76].mxu1 %vm798_vm2, %v3142_v53  ;;  %2173 = vmatmul.mubr.msk.bf16.gmra.mrb[116].mxu0 %vm798_vm2, %v3142_v53 }
 0x210   : > { %2298 = vmatprep.mubr.msk.bf16.mxu1 %vm798_vm2, %v3052_v61 }
 0x217   : > { %2299 = vmatmul.mubr.msk.bf16.vlgmr.msra.gmra.mrb[80].mxu1 %vm798_vm2, %v3050_v59 }
 0x218   : > { %2302 = vmatprep.mubr.msk.bf16.mxu1 %vm798_vm2, %v3062_v5 }
 0x21f   : > { %2303 = vmatmul.mubr.msk.bf16.gmra.mrb[84].mxu1 %vm798_vm2, %v3060_v3 }
 0x220   : > { %2306 = vmatprep.mubr.msk.bf16.mxu1 %vm798_vm2, %v3074_v13 }
 0x227   : > { %2307 = vmatmul.mubr.msk.bf16.gmra.mrb[88].mxu1 %vm798_vm2, %v3072_v11 }
 0x228   : > { %2310 = vmatprep.mubr.msk.bf16.mxu1 %vm798_vm2, %v3084_v19 }
 0x22f   : > { %2311 = vmatmul.mubr.msk.bf16.gmra.mrb[92].mxu1 %vm798_vm2, %v3082_v17 }
 0x230   : > { %2314 = vmatprep.mubr.msk.bf16.mxu1 %vm798_vm2, %v3094_v25 }
 0x237   : > { %2315 = vmatmul.mubr.msk.bf16.gmra.mrb[96].mxu1 %vm798_vm2, %v3092_v23 }
 0x238   : > { %2318 = vmatprep.mubr.msk.bf16.mxu1 %vm798_vm2, %v3104_v31 }
 0x23f   : > { %2319 = vmatmul.mubr.msk.bf16.gmra.mrb[100].mxu1 %vm798_vm2, %v3102_v29 }
 0x240   : > { %2322 = vmatprep.mubr.msk.bf16.mxu1 %vm798_vm2, %v3114_v37 }
 0x247   : > { %2323 = vmatmul.mubr.msk.bf16.gmra.mrb[104].mxu1 %vm798_vm2, %v3112_v35 }
 0x248   : > { %2326 = vmatprep.mubr.msk.bf16.mxu1 %vm798_vm2, %v3124_v43 }
 0x24a   : > { %v908_v55 = vpop.f32.mrb[0].mxu1  ;;  %v1141_v57 = vpop.f32.mrb[40].mxu0 }
 0x24b   : > { %v1533_v58 = vmul.f32 0.003921569, %v908_v55  ;;  %v1535_v59 = vmul.f32 0.003921569, %v1141_v57  ;;  %v910_v60 = vpop.f32.mrb[1].mxu1  ;;  %v1143_v61 = vpop.f32.mrb[41].mxu0 }
 0x24c   : > { %v1534_v62 = vmul.f32 0.003921569, %v910_v60  ;;  %v1536_v63 = vmul.f32 0.003921569, %v1143_v61  ;;  %v912_v0 = vpop.f32.mrb[2].mxu1  ;;  %v1145_v1 = vpop.f32.mrb[42].mxu0 }
 0x24d   : > { %1733 = vst [vmem:[%s3243_s1] sm:$0xff] %v1533_v58  ;;  %1735 = vst [vmem:[%s3243_s1 + $0x10] sm:$0xff] %v1535_v59  ;;  %v1538_v2 = vmul.f32 0.003921569, %v912_v0  ;;  %v1540_v3 = vmul.f32 0.003921569, %v1145_v1  ;;  %v914_v4 = vpop.f32.mrb[3].mxu1 }
 0x24e   : > { %v1147_v5 = vpop.f32.mrb[43].mxu0  ;;  %1734 = vst [vmem:[%s3243_s1 + $0x8] sm:$0xff] %v1534_v62  ;;  %1736 = vst [vmem:[%s3243_s1 + $0x18] sm:$0xff] %v1536_v63  ;;  %v1539_v6 = vmul.f32 0.003921569, %v914_v4 }
 0x24f   : > { %v1541_v7 = vmul.f32 0.003921569, %v1147_v5  ;;  %1738 = vst [vmem:[%s3243_s1 + $0x28] sm:$0xff] %v1538_v2  ;;  %1740 = vst [vmem:[%s3243_s1 + $0x38] sm:$0xff] %v1540_v3  ;;  %2327 = vmatmul.mubr.msk.bf16.gmra.mrb[108].mxu1 %vm798_vm2, %v3122_v41 }
 0x250   : > { %1739 = vst [vmem:[%s3243_s1 + $0x30] sm:$0xff] %v1539_v6  ;;  %2330 = vmatprep.mubr.msk.bf16.mxu1 %vm798_vm2, %v3134_v49 }
 0x251   : > { %1741 = vst [vmem:[%s3243_s1 + $0x40] sm:$0xff] %v1541_v7 }
 0x252   : > { %v918_v8 = vpop.f32.mrb[4].mxu1  ;;  %v1151_v9 = vpop.f32.mrb[44].mxu0 }
 0x253   : > { %v1543_v10 = vmul.f32 0.003921569, %v918_v8  ;;  %v1545_v11 = vmul.f32 0.003921569, %v1151_v9  ;;  %v920_v12 = vpop.f32.mrb[5].mxu1  ;;  %v1153_v13 = vpop.f32.mrb[45].mxu0 }
 0x254   : > { %v1544_v14 = vmul.f32 0.003921569, %v920_v12  ;;  %v1546_v15 = vmul.f32 0.003921569, %v1153_v13  ;;  %v922_v16 = vpop.f32.mrb[6].mxu1  ;;  %v1155_v17 = vpop.f32.mrb[46].mxu0 }
 0x255   : > { %1743 = vst [vmem:[%s3243_s1 + $0x50] sm:$0xff] %v1543_v10  ;;  %1745 = vst [vmem:[%s3243_s1 + $0x60] sm:$0xff] %v1545_v11  ;;  %v1548_v18 = vmul.f32 0.003921569, %v922_v16  ;;  %v1550_v19 = vmul.f32 0.003921569, %v1155_v17 }
 0x256   : > { %v924_v20 = vpop.f32.mrb[7].mxu1  ;;  %v1157_v21 = vpop.f32.mrb[47].mxu0  ;;  %1744 = vst [vmem:[%s3243_s1 + $0x58] sm:$0xff] %v1544_v14  ;;  %1746 = vst [vmem:[%s3243_s1 + $0x68] sm:$0xff] %v1546_v15 }
 0x257   : > { %v1549_v22 = vmul.f32 0.003921569, %v924_v20  ;;  %v1551_v23 = vmul.f32 0.003921569, %v1157_v21  ;;  %1748 = vst [vmem:[%s3243_s1 + $0x78] sm:$0xff] %v1548_v18  ;;  %1750 = vst [vmem:[%s3243_s1 + $0x88] sm:$0xff] %v1550_v19  ;;  %2331 = vmatmul.mubr.msk.bf16.gmra.mrb[112].mxu1 %vm798_vm2, %v3132_v47 }
 0x258   : > { %2334 = vmatprep.mubr.msk.bf16.mxu1 %vm798_vm2, %v3144_v56 }
 0x259   : > { %1749 = vst [vmem:[%s3243_s1 + $0x80] sm:$0xff] %v1549_v22  ;;  %1751 = vst [vmem:[%s3243_s1 + $0x90] sm:$0xff] %v1551_v23 }
 0x25a   : > { %v928_v24 = vpop.f32.mrb[8].mxu1  ;;  %v1161_v25 = vpop.f32.mrb[48].mxu0 }
 0x25b   : > { %v1553_v26 = vmul.f32 0.003921569, %v928_v24  ;;  %v1555_v27 = vmul.f32 0.003921569, %v1161_v25  ;;  %v930_v28 = vpop.f32.mrb[9].mxu1  ;;  %v1163_v29 = vpop.f32.mrb[49].mxu0 }
 0x25c   : > { %v1554_v30 = vmul.f32 0.003921569, %v930_v28  ;;  %v1556_v31 = vmul.f32 0.003921569, %v1163_v29  ;;  %v932_v32 = vpop.f32.mrb[10].mxu1  ;;  %v1165_v33 = vpop.f32.mrb[50].mxu0 }
 0x25d   : > { %1753 = vst [vmem:[%s3243_s1 + $0xa0] sm:$0xff] %v1553_v26  ;;  %1755 = vst [vmem:[%s3243_s1 + $0xb0] sm:$0xff] %v1555_v27  ;;  %v1558_v34 = vmul.f32 0.003921569, %v932_v32  ;;  %v1560_v35 = vmul.f32 0.003921569, %v1165_v33 }
 0x25e   : > { %v934_v36 = vpop.f32.mrb[11].mxu1  ;;  %v1167_v37 = vpop.f32.mrb[51].mxu0  ;;  %1754 = vst [vmem:[%s3243_s1 + $0xa8] sm:$0xff] %v1554_v30  ;;  %1756 = vst [vmem:[%s3243_s1 + $0xb8] sm:$0xff] %v1556_v31 }
 0x25f   : > { %v1559_v38 = vmul.f32 0.003921569, %v934_v36  ;;  %v1561_v39 = vmul.f32 0.003921569, %v1167_v37  ;;  %1758 = vst [vmem:[%s3243_s1 + $0xc8] sm:$0xff] %v1558_v34  ;;  %1760 = vst [vmem:[%s3243_s1 + $0xd8] sm:$0xff] %v1560_v35  ;;  %2335 = vmatmul.mubr.msk.bf16.gmra.mrb[116].mxu1 %vm798_vm2, %v3142_v53 }
 0x261   : > { %1759 = vst [vmem:[%s3243_s1 + $0xd0] sm:$0xff] %v1559_v38  ;;  %1761 = vst [vmem:[%s3243_s1 + $0xe0] sm:$0xff] %v1561_v39 }
 0x262   : > { %v938_v40 = vpop.f32.mrb[12].mxu1  ;;  %v1171_v41 = vpop.f32.mrb[52].mxu0 }
 0x263   : > { %v1563_v42 = vmul.f32 0.003921569, %v938_v40  ;;  %v1565_v43 = vmul.f32 0.003921569, %v1171_v41  ;;  %v940_v44 = vpop.f32.mrb[13].mxu1  ;;  %v1173_v45 = vpop.f32.mrb[53].mxu0 }
 0x264   : > { %v1564_v46 = vmul.f32 0.003921569, %v940_v44  ;;  %v1566_v47 = vmul.f32 0.003921569, %v1173_v45  ;;  %v942_v48 = vpop.f32.mrb[14].mxu1  ;;  %v1175_v49 = vpop.f32.mrb[54].mxu0 }
 0x265   : > { %1763 = vst [vmem:[%s3243_s1 + $0xf0] sm:$0xff] %v1563_v42  ;;  %1765 = vst [vmem:[%s3243_s1 + $0x100] sm:$0xff] %v1565_v43  ;;  %v1568_v50 = vmul.f32 0.003921569, %v942_v48  ;;  %v1570_v51 = vmul.f32 0.003921569, %v1175_v49 }
 0x266   : > { %v944_v52 = vpop.f32.mrb[15].mxu1  ;;  %v1177_v53 = vpop.f32.mrb[55].mxu0  ;;  %1764 = vst [vmem:[%s3243_s1 + $0xf8] sm:$0xff] %v1564_v46  ;;  %1766 = vst [vmem:[%s3243_s1 + $0x108] sm:$0xff] %v1566_v47 }
 0x267   : > { %v1569_v54 = vmul.f32 0.003921569, %v944_v52  ;;  %v1571_v56 = vmul.f32 0.003921569, %v1177_v53  ;;  %1768 = vst [vmem:[%s3243_s1 + $0x118] sm:$0xff] %v1568_v50  ;;  %1770 = vst [vmem:[%s3243_s1 + $0x128] sm:$0xff] %v1570_v51 }
 0x269   : > { %1769 = vst [vmem:[%s3243_s1 + $0x120] sm:$0xff] %v1569_v54  ;;  %1771 = vst [vmem:[%s3243_s1 + $0x130] sm:$0xff] %v1571_v56 }
 0x26a   : > { %v948_v55 = vpop.f32.mrb[16].mxu1  ;;  %v1181_v57 = vpop.f32.mrb[56].mxu0 }
 0x26b   : > { %v1573_v58 = vmul.f32 0.003921569, %v948_v55  ;;  %v1575_v59 = vmul.f32 0.003921569, %v1181_v57  ;;  %v950_v60 = vpop.f32.mrb[17].mxu1  ;;  %v1183_v61 = vpop.f32.mrb[57].mxu0 }
 0x26c   : > { %v1574_v62 = vmul.f32 0.003921569, %v950_v60  ;;  %v1576_v63 = vmul.f32 0.003921569, %v1183_v61  ;;  %v952_v0 = vpop.f32.mrb[18].mxu1  ;;  %v1185_v1 = vpop.f32.mrb[58].mxu0 }
 0x26d   : > { %1773 = vst [vmem:[%s3243_s1 + $0x140] sm:$0xff] %v1573_v58  ;;  %1775 = vst [vmem:[%s3243_s1 + $0x150] sm:$0xff] %v1575_v59  ;;  %v1578_v2 = vmul.f32 0.003921569, %v952_v0  ;;  %v1580_v3 = vmul.f32 0.003921569, %v1185_v1 }
 0x26e   : > { %v954_v4 = vpop.f32.mrb[19].mxu1  ;;  %v1187_v5 = vpop.f32.mrb[59].mxu0  ;;  %1774 = vst [vmem:[%s3243_s1 + $0x148] sm:$0xff] %v1574_v62  ;;  %1776 = vst [vmem:[%s3243_s1 + $0x158] sm:$0xff] %v1576_v63 }
 0x26f   : > { %v1579_v6 = vmul.f32 0.003921569, %v954_v4  ;;  %v1581_v7 = vmul.f32 0.003921569, %v1187_v5  ;;  %1778 = vst [vmem:[%s3243_s1 + $0x168] sm:$0xff] %v1578_v2  ;;  %1780 = vst [vmem:[%s3243_s1 + $0x178] sm:$0xff] %v1580_v3 }
 0x271   : > { %1779 = vst [vmem:[%s3243_s1 + $0x170] sm:$0xff] %v1579_v6  ;;  %1781 = vst [vmem:[%s3243_s1 + $0x180] sm:$0xff] %v1581_v7 }
 0x272   : > { %v958_v8 = vpop.f32.mrb[20].mxu1  ;;  %v1191_v9 = vpop.f32.mrb[60].mxu0 }
 0x273   : > { %v1583_v10 = vmul.f32 0.003921569, %v958_v8  ;;  %v1585_v11 = vmul.f32 0.003921569, %v1191_v9  ;;  %v960_v12 = vpop.f32.mrb[21].mxu1  ;;  %v1193_v13 = vpop.f32.mrb[61].mxu0 }
 0x274   : > { %v1584_v14 = vmul.f32 0.003921569, %v960_v12  ;;  %v1586_v15 = vmul.f32 0.003921569, %v1193_v13  ;;  %v962_v16 = vpop.f32.mrb[22].mxu1  ;;  %v1195_v17 = vpop.f32.mrb[62].mxu0 }
 0x275   : > { %1783 = vst [vmem:[%s3243_s1 + $0x190] sm:$0xff] %v1583_v10  ;;  %1785 = vst [vmem:[%s3243_s1 + $0x1a0] sm:$0xff] %v1585_v11  ;;  %v1588_v18 = vmul.f32 0.003921569, %v962_v16  ;;  %v1590_v19 = vmul.f32 0.003921569, %v1195_v17 }
 0x276   : > { %v964_v20 = vpop.f32.mrb[23].mxu1  ;;  %v1197_v21 = vpop.f32.mrb[63].mxu0  ;;  %1784 = vst [vmem:[%s3243_s1 + $0x198] sm:$0xff] %v1584_v14  ;;  %1786 = vst [vmem:[%s3243_s1 + $0x1a8] sm:$0xff] %v1586_v15 }
 0x277   : > { %v1589_v22 = vmul.f32 0.003921569, %v964_v20  ;;  %v1591_v23 = vmul.f32 0.003921569, %v1197_v21  ;;  %1788 = vst [vmem:[%s3243_s1 + $0x1b8] sm:$0xff] %v1588_v18  ;;  %1790 = vst [vmem:[%s3243_s1 + $0x1c8] sm:$0xff] %v1590_v19 }
 0x279   : > { %1789 = vst [vmem:[%s3243_s1 + $0x1c0] sm:$0xff] %v1589_v22  ;;  %1791 = vst [vmem:[%s3243_s1 + $0x1d0] sm:$0xff] %v1591_v23 }
 0x27a   : > { %v968_v24 = vpop.f32.mrb[24].mxu1  ;;  %v1201_v25 = vpop.f32.mrb[64].mxu0 }
 0x27b   : > { %v1593_v26 = vmul.f32 0.003921569, %v968_v24  ;;  %v1595_v27 = vmul.f32 0.003921569, %v1201_v25  ;;  %v970_v28 = vpop.f32.mrb[25].mxu1  ;;  %v1203_v29 = vpop.f32.mrb[65].mxu0 }
 0x27c   : > { %v1594_v30 = vmul.f32 0.003921569, %v970_v28  ;;  %v1596_v31 = vmul.f32 0.003921569, %v1203_v29  ;;  %v972_v32 = vpop.f32.mrb[26].mxu1  ;;  %v1205_v33 = vpop.f32.mrb[66].mxu0 }
 0x27d   : > { %1793 = vst [vmem:[%s3243_s1 + $0x1e0] sm:$0xff] %v1593_v26  ;;  %1795 = vst [vmem:[%s3243_s1 + $0x1f0] sm:$0xff] %v1595_v27  ;;  %v1598_v34 = vmul.f32 0.003921569, %v972_v32  ;;  %v1600_v35 = vmul.f32 0.003921569, %v1205_v33 }
 0x27e   : > { %v974_v36 = vpop.f32.mrb[27].mxu1  ;;  %v1207_v37 = vpop.f32.mrb[67].mxu0  ;;  %1794 = vst [vmem:[%s3243_s1 + $0x1e8] sm:$0xff] %v1594_v30  ;;  %1796 = vst [vmem:[%s3243_s1 + $0x1f8] sm:$0xff] %v1596_v31 }
 0x27f   : > { %v1599_v38 = vmul.f32 0.003921569, %v974_v36  ;;  %v1601_v39 = vmul.f32 0.003921569, %v1207_v37  ;;  %1798 = vst [vmem:[%s3243_s1 + $0x208] sm:$0xff] %v1598_v34  ;;  %1800 = vst [vmem:[%s3243_s1 + $0x218] sm:$0xff] %v1600_v35 }
 0x281   : > { %1799 = vst [vmem:[%s3243_s1 + $0x210] sm:$0xff] %v1599_v38  ;;  %1801 = vst [vmem:[%s3243_s1 + $0x220] sm:$0xff] %v1601_v39 }
 0x282   : > { %v978_v40 = vpop.f32.mrb[28].mxu1  ;;  %v1211_v41 = vpop.f32.mrb[68].mxu0 }
 0x283   : > { %v1603_v42 = vmul.f32 0.003921569, %v978_v40  ;;  %v1605_v43 = vmul.f32 0.003921569, %v1211_v41  ;;  %v980_v44 = vpop.f32.mrb[29].mxu1  ;;  %v1213_v45 = vpop.f32.mrb[69].mxu0 }
 0x284   : > { %v1604_v46 = vmul.f32 0.003921569, %v980_v44  ;;  %v1606_v47 = vmul.f32 0.003921569, %v1213_v45  ;;  %v982_v48 = vpop.f32.mrb[30].mxu1  ;;  %v1215_v49 = vpop.f32.mrb[70].mxu0 }
 0x285   : > { %1803 = vst [vmem:[%s3243_s1 + $0x230] sm:$0xff] %v1603_v42  ;;  %1805 = vst [vmem:[%s3243_s1 + $0x240] sm:$0xff] %v1605_v43  ;;  %v1608_v50 = vmul.f32 0.003921569, %v982_v48  ;;  %v1610_v51 = vmul.f32 0.003921569, %v1215_v49 }
 0x286   : > { %v984_v52 = vpop.f32.mrb[31].mxu1  ;;  %v1217_v53 = vpop.f32.mrb[71].mxu0  ;;  %1804 = vst [vmem:[%s3243_s1 + $0x238] sm:$0xff] %v1604_v46  ;;  %1806 = vst [vmem:[%s3243_s1 + $0x248] sm:$0xff] %v1606_v47 }
 0x287   : > { %v1609_v54 = vmul.f32 0.003921569, %v984_v52  ;;  %v1611_v56 = vmul.f32 0.003921569, %v1217_v53  ;;  %1808 = vst [vmem:[%s3243_s1 + $0x258] sm:$0xff] %v1608_v50  ;;  %1810 = vst [vmem:[%s3243_s1 + $0x268] sm:$0xff] %v1610_v51 }
 0x289   : > { %1809 = vst [vmem:[%s3243_s1 + $0x260] sm:$0xff] %v1609_v54  ;;  %1811 = vst [vmem:[%s3243_s1 + $0x270] sm:$0xff] %v1611_v56 }
 0x28a   : > { %v988_v55 = vpop.f32.mrb[32].mxu1  ;;  %v1221_v57 = vpop.f32.mrb[72].mxu0 }
 0x28b   : > { %v1613_v58 = vmul.f32 0.003921569, %v988_v55  ;;  %v1615_v59 = vmul.f32 0.003921569, %v1221_v57  ;;  %v990_v60 = vpop.f32.mrb[33].mxu1  ;;  %v1223_v61 = vpop.f32.mrb[73].mxu0 }
 0x28c   : > { %v1614_v62 = vmul.f32 0.003921569, %v990_v60  ;;  %v1616_v63 = vmul.f32 0.003921569, %v1223_v61  ;;  %v992_v0 = vpop.f32.mrb[34].mxu1  ;;  %v1225_v1 = vpop.f32.mrb[74].mxu0 }
 0x28d   : > { %1813 = vst [vmem:[%s3243_s1 + $0x280] sm:$0xff] %v1613_v58  ;;  %1815 = vst [vmem:[%s3243_s1 + $0x290] sm:$0xff] %v1615_v59  ;;  %v1618_v2 = vmul.f32 0.003921569, %v992_v0  ;;  %v1620_v3 = vmul.f32 0.003921569, %v1225_v1 }
 0x28e   : > { %v994_v4 = vpop.f32.mrb[35].mxu1  ;;  %v1227_v5 = vpop.f32.mrb[75].mxu0  ;;  %1814 = vst [vmem:[%s3243_s1 + $0x288] sm:$0xff] %v1614_v62  ;;  %1816 = vst [vmem:[%s3243_s1 + $0x298] sm:$0xff] %v1616_v63 }
 0x28f   : > { %v1619_v6 = vmul.f32 0.003921569, %v994_v4  ;;  %v1621_v7 = vmul.f32 0.003921569, %v1227_v5  ;;  %1818 = vst [vmem:[%s3243_s1 + $0x2a8] sm:$0xff] %v1618_v2  ;;  %1820 = vst [vmem:[%s3243_s1 + $0x2b8] sm:$0xff] %v1620_v3 }
 0x291   : > { %1819 = vst [vmem:[%s3243_s1 + $0x2b0] sm:$0xff] %v1619_v6  ;;  %1821 = vst [vmem:[%s3243_s1 + $0x2c0] sm:$0xff] %v1621_v7 }
 0x292   : > { %v998_v8 = vpop.f32.mrb[36].mxu1  ;;  %v1231_v9 = vpop.f32.mrb[76].mxu0 }
 0x293   : > { %v1623_v10 = vmul.f32 0.003921569, %v998_v8  ;;  %v1625_v11 = vmul.f32 0.003921569, %v1231_v9  ;;  %v1000_v12 = vpop.f32.mrb[37].mxu1  ;;  %v1233_v13 = vpop.f32.mrb[77].mxu0 }
 0x294   : > { %v1624_v14 = vmul.f32 0.003921569, %v1000_v12  ;;  %v1626_v15 = vmul.f32 0.003921569, %v1233_v13  ;;  %v1002_v16 = vpop.f32.mrb[38].mxu1  ;;  %v1235_v17 = vpop.f32.mrb[78].mxu0 }
 0x295   : > { %1823 = vst [vmem:[%s3243_s1 + $0x2d0] sm:$0xff] %v1623_v10  ;;  %1825 = vst [vmem:[%s3243_s1 + $0x2e0] sm:$0xff] %v1625_v11  ;;  %v1628_v18 = vmul.f32 0.003921569, %v1002_v16  ;;  %v1630_v19 = vmul.f32 0.003921569, %v1235_v17 }
 0x296   : > { %v1004_v20 = vpop.f32.mrb[39].mxu1  ;;  %v1237_v21 = vpop.f32.mrb[79].mxu0  ;;  %1824 = vst [vmem:[%s3243_s1 + $0x2d8] sm:$0xff] %v1624_v14  ;;  %1826 = vst [vmem:[%s3243_s1 + $0x2e8] sm:$0xff] %v1626_v15 }
 0x297   : > { %v1629_v22 = vmul.f32 0.003921569, %v1004_v20  ;;  %v1631_v23 = vmul.f32 0.003921569, %v1237_v21  ;;  %1828 = vst [vmem:[%s3243_s1 + $0x2f8] sm:$0xff] %v1628_v18  ;;  %1830 = vst [vmem:[%s3243_s1 + $0x308] sm:$0xff] %v1630_v19 }
 0x299   : > { %1829 = vst [vmem:[%s3243_s1 + $0x300] sm:$0xff] %v1629_v22  ;;  %1831 = vst [vmem:[%s3243_s1 + $0x310] sm:$0xff] %v1631_v23 }
 0x29a   : > { %v1008_v24 = vpop.f32.mrb[40].mxu1  ;;  %v1241_v25 = vpop.f32.mrb[80].mxu0 }
 0x29b   : > { %v1633_v26 = vmul.f32 0.003921569, %v1008_v24  ;;  %v1635_v27 = vmul.f32 0.003921569, %v1241_v25  ;;  %v1010_v28 = vpop.f32.mrb[41].mxu1  ;;  %v1243_v29 = vpop.f32.mrb[81].mxu0 }
 0x29c   : > { %v1634_v30 = vmul.f32 0.003921569, %v1010_v28  ;;  %v1636_v31 = vmul.f32 0.003921569, %v1243_v29  ;;  %v1012_v32 = vpop.f32.mrb[42].mxu1  ;;  %v1245_v33 = vpop.f32.mrb[82].mxu0 }
 0x29d   : > { %1833 = vst [vmem:[%s3243_s1 + $0x320] sm:$0xff] %v1633_v26  ;;  %1835 = vst [vmem:[%s3243_s1 + $0x330] sm:$0xff] %v1635_v27  ;;  %v1638_v34 = vmul.f32 0.003921569, %v1012_v32  ;;  %v1640_v35 = vmul.f32 0.003921569, %v1245_v33 }
 0x29e   : > { %v1014_v36 = vpop.f32.mrb[43].mxu1  ;;  %v1247_v37 = vpop.f32.mrb[83].mxu0  ;;  %1834 = vst [vmem:[%s3243_s1 + $0x328] sm:$0xff] %v1634_v30  ;;  %1836 = vst [vmem:[%s3243_s1 + $0x338] sm:$0xff] %v1636_v31 }
 0x29f   : > { %v1639_v38 = vmul.f32 0.003921569, %v1014_v36  ;;  %v1641_v39 = vmul.f32 0.003921569, %v1247_v37  ;;  %1838 = vst [vmem:[%s3243_s1 + $0x348] sm:$0xff] %v1638_v34  ;;  %1840 = vst [vmem:[%s3243_s1 + $0x358] sm:$0xff] %v1640_v35 }
 0x2a1   : > { %1839 = vst [vmem:[%s3243_s1 + $0x350] sm:$0xff] %v1639_v38  ;;  %1841 = vst [vmem:[%s3243_s1 + $0x360] sm:$0xff] %v1641_v39 }
 0x2a2   : > { %v1018_v40 = vpop.f32.mrb[44].mxu1  ;;  %v1251_v41 = vpop.f32.mrb[84].mxu0 }
 0x2a3   : > { %v1643_v42 = vmul.f32 0.003921569, %v1018_v40  ;;  %v1645_v43 = vmul.f32 0.003921569, %v1251_v41  ;;  %v1020_v44 = vpop.f32.mrb[45].mxu1  ;;  %v1253_v45 = vpop.f32.mrb[85].mxu0 }
 0x2a4   : > { %v1644_v46 = vmul.f32 0.003921569, %v1020_v44  ;;  %v1646_v47 = vmul.f32 0.003921569, %v1253_v45  ;;  %v1022_v48 = vpop.f32.mrb[46].mxu1  ;;  %v1255_v49 = vpop.f32.mrb[86].mxu0 }
 0x2a5   : > { %1843 = vst [vmem:[%s3243_s1 + $0x370] sm:$0xff] %v1643_v42  ;;  %1845 = vst [vmem:[%s3243_s1 + $0x380] sm:$0xff] %v1645_v43  ;;  %v1648_v50 = vmul.f32 0.003921569, %v1022_v48  ;;  %v1650_v51 = vmul.f32 0.003921569, %v1255_v49 }
 0x2a6   : > { %v1024_v52 = vpop.f32.mrb[47].mxu1  ;;  %v1257_v53 = vpop.f32.mrb[87].mxu0  ;;  %1844 = vst [vmem:[%s3243_s1 + $0x378] sm:$0xff] %v1644_v46  ;;  %1846 = vst [vmem:[%s3243_s1 + $0x388] sm:$0xff] %v1646_v47 }
 0x2a7   : > { %v1649_v54 = vmul.f32 0.003921569, %v1024_v52  ;;  %v1651_v56 = vmul.f32 0.003921569, %v1257_v53  ;;  %1848 = vst [vmem:[%s3243_s1 + $0x398] sm:$0xff] %v1648_v50  ;;  %1850 = vst [vmem:[%s3243_s1 + $0x3a8] sm:$0xff] %v1650_v51 }
 0x2a9   : > { %1849 = vst [vmem:[%s3243_s1 + $0x3a0] sm:$0xff] %v1649_v54  ;;  %1851 = vst [vmem:[%s3243_s1 + $0x3b0] sm:$0xff] %v1651_v56 }
 0x2aa   : > { %v1028_v55 = vpop.f32.mrb[48].mxu1  ;;  %v1261_v57 = vpop.f32.mrb[88].mxu0 }
 0x2ab   : > { %v1653_v58 = vmul.f32 0.003921569, %v1028_v55  ;;  %v1655_v59 = vmul.f32 0.003921569, %v1261_v57  ;;  %v1030_v60 = vpop.f32.mrb[49].mxu1  ;;  %v1263_v61 = vpop.f32.mrb[89].mxu0 }
 0x2ac   : > { %v1654_v62 = vmul.f32 0.003921569, %v1030_v60  ;;  %v1656_v63 = vmul.f32 0.003921569, %v1263_v61  ;;  %v1032_v0 = vpop.f32.mrb[50].mxu1  ;;  %v1265_v1 = vpop.f32.mrb[90].mxu0 }
 0x2ad   : > { %1853 = vst [vmem:[%s3243_s1 + $0x3c0] sm:$0xff] %v1653_v58  ;;  %1855 = vst [vmem:[%s3243_s1 + $0x3d0] sm:$0xff] %v1655_v59  ;;  %v1658_v2 = vmul.f32 0.003921569, %v1032_v0  ;;  %v1660_v3 = vmul.f32 0.003921569, %v1265_v1 }
 0x2ae   : > { %v1034_v4 = vpop.f32.mrb[51].mxu1  ;;  %v1267_v5 = vpop.f32.mrb[91].mxu0  ;;  %1854 = vst [vmem:[%s3243_s1 + $0x3c8] sm:$0xff] %v1654_v62  ;;  %1856 = vst [vmem:[%s3243_s1 + $0x3d8] sm:$0xff] %v1656_v63 }
 0x2af   : > { %v1659_v6 = vmul.f32 0.003921569, %v1034_v4  ;;  %v1661_v7 = vmul.f32 0.003921569, %v1267_v5  ;;  %1858 = vst [vmem:[%s3243_s1 + $0x3e8] sm:$0xff] %v1658_v2  ;;  %1860 = vst [vmem:[%s3243_s1 + $0x3f8] sm:$0xff] %v1660_v3 }
 0x2b1   : > { %1859 = vst [vmem:[%s3243_s1 + $0x3f0] sm:$0xff] %v1659_v6  ;;  %1861 = vst [vmem:[%s3243_s1 + $0x400] sm:$0xff] %v1661_v7 }
 0x2b2   : > { %v1038_v8 = vpop.f32.mrb[52].mxu1  ;;  %v1271_v9 = vpop.f32.mrb[92].mxu0 }
 0x2b3   : > { %v1663_v10 = vmul.f32 0.003921569, %v1038_v8  ;;  %v1665_v11 = vmul.f32 0.003921569, %v1271_v9  ;;  %v1040_v12 = vpop.f32.mrb[53].mxu1  ;;  %v1273_v13 = vpop.f32.mrb[93].mxu0 }
 0x2b4   : > { %v1664_v14 = vmul.f32 0.003921569, %v1040_v12  ;;  %v1666_v15 = vmul.f32 0.003921569, %v1273_v13  ;;  %v1042_v16 = vpop.f32.mrb[54].mxu1  ;;  %v1275_v17 = vpop.f32.mrb[94].mxu0 }
 0x2b5   : > { %1863 = vst [vmem:[%s3243_s1 + $0x410] sm:$0xff] %v1663_v10  ;;  %1865 = vst [vmem:[%s3243_s1 + $0x420] sm:$0xff] %v1665_v11  ;;  %v1668_v18 = vmul.f32 0.003921569, %v1042_v16  ;;  %v1670_v19 = vmul.f32 0.003921569, %v1275_v17 }
 0x2b6   : > { %v1044_v20 = vpop.f32.mrb[55].mxu1  ;;  %v1277_v21 = vpop.f32.mrb[95].mxu0  ;;  %1864 = vst [vmem:[%s3243_s1 + $0x418] sm:$0xff] %v1664_v14  ;;  %1866 = vst [vmem:[%s3243_s1 + $0x428] sm:$0xff] %v1666_v15 }
 0x2b7   : > { %v1669_v22 = vmul.f32 0.003921569, %v1044_v20  ;;  %v1671_v23 = vmul.f32 0.003921569, %v1277_v21  ;;  %1868 = vst [vmem:[%s3243_s1 + $0x438] sm:$0xff] %v1668_v18  ;;  %1870 = vst [vmem:[%s3243_s1 + $0x448] sm:$0xff] %v1670_v19 }
 0x2b9   : > { %1869 = vst [vmem:[%s3243_s1 + $0x440] sm:$0xff] %v1669_v22  ;;  %1871 = vst [vmem:[%s3243_s1 + $0x450] sm:$0xff] %v1671_v23 }
 0x2ba   : > { %v1048_v24 = vpop.f32.mrb[56].mxu1  ;;  %v1281_v25 = vpop.f32.mrb[96].mxu0 }
 0x2bb   : > { %v1673_v26 = vmul.f32 0.003921569, %v1048_v24  ;;  %v1675_v27 = vmul.f32 0.003921569, %v1281_v25  ;;  %v1050_v28 = vpop.f32.mrb[57].mxu1  ;;  %v1283_v29 = vpop.f32.mrb[97].mxu0 }
 0x2bc   : > { %v1674_v30 = vmul.f32 0.003921569, %v1050_v28  ;;  %v1676_v31 = vmul.f32 0.003921569, %v1283_v29  ;;  %v1052_v32 = vpop.f32.mrb[58].mxu1  ;;  %v1285_v33 = vpop.f32.mrb[98].mxu0 }
 0x2bd   : > { %1873 = vst [vmem:[%s3243_s1 + $0x460] sm:$0xff] %v1673_v26  ;;  %1875 = vst [vmem:[%s3243_s1 + $0x470] sm:$0xff] %v1675_v27  ;;  %v1678_v34 = vmul.f32 0.003921569, %v1052_v32  ;;  %v1680_v35 = vmul.f32 0.003921569, %v1285_v33 }
 0x2be   : > { %v1054_v36 = vpop.f32.mrb[59].mxu1  ;;  %v1287_v37 = vpop.f32.mrb[99].mxu0  ;;  %1874 = vst [vmem:[%s3243_s1 + $0x468] sm:$0xff] %v1674_v30  ;;  %1876 = vst [vmem:[%s3243_s1 + $0x478] sm:$0xff] %v1676_v31 }
 0x2bf   : > { %v1679_v38 = vmul.f32 0.003921569, %v1054_v36  ;;  %v1681_v39 = vmul.f32 0.003921569, %v1287_v37  ;;  %1878 = vst [vmem:[%s3243_s1 + $0x488] sm:$0xff] %v1678_v34  ;;  %1880 = vst [vmem:[%s3243_s1 + $0x498] sm:$0xff] %v1680_v35 }
 0x2c1   : > { %1879 = vst [vmem:[%s3243_s1 + $0x490] sm:$0xff] %v1679_v38  ;;  %1881 = vst [vmem:[%s3243_s1 + $0x4a0] sm:$0xff] %v1681_v39 }
 0x2c2   : > { %v1058_v40 = vpop.f32.mrb[60].mxu1  ;;  %v1291_v41 = vpop.f32.mrb[100].mxu0 }
 0x2c3   : > { %v1683_v42 = vmul.f32 0.003921569, %v1058_v40  ;;  %v1685_v43 = vmul.f32 0.003921569, %v1291_v41  ;;  %v1060_v44 = vpop.f32.mrb[61].mxu1  ;;  %v1293_v45 = vpop.f32.mrb[101].mxu0 }
 0x2c4   : > { %v1684_v46 = vmul.f32 0.003921569, %v1060_v44  ;;  %v1686_v47 = vmul.f32 0.003921569, %v1293_v45  ;;  %v1062_v48 = vpop.f32.mrb[62].mxu1  ;;  %v1295_v49 = vpop.f32.mrb[102].mxu0 }
 0x2c5   : > { %1883 = vst [vmem:[%s3243_s1 + $0x4b0] sm:$0xff] %v1683_v42  ;;  %1885 = vst [vmem:[%s3243_s1 + $0x4c0] sm:$0xff] %v1685_v43  ;;  %v1688_v50 = vmul.f32 0.003921569, %v1062_v48  ;;  %v1690_v51 = vmul.f32 0.003921569, %v1295_v49 }
 0x2c6   : > { %v1064_v52 = vpop.f32.mrb[63].mxu1  ;;  %v1297_v53 = vpop.f32.mrb[103].mxu0  ;;  %1884 = vst [vmem:[%s3243_s1 + $0x4b8] sm:$0xff] %v1684_v46  ;;  %1886 = vst [vmem:[%s3243_s1 + $0x4c8] sm:$0xff] %v1686_v47 }
 0x2c7   : > { %v1689_v54 = vmul.f32 0.003921569, %v1064_v52  ;;  %v1691_v56 = vmul.f32 0.003921569, %v1297_v53  ;;  %1888 = vst [vmem:[%s3243_s1 + $0x4d8] sm:$0xff] %v1688_v50  ;;  %1890 = vst [vmem:[%s3243_s1 + $0x4e8] sm:$0xff] %v1690_v51 }
 0x2c9   : > { %1889 = vst [vmem:[%s3243_s1 + $0x4e0] sm:$0xff] %v1689_v54  ;;  %1891 = vst [vmem:[%s3243_s1 + $0x4f0] sm:$0xff] %v1691_v56 }
 0x2ca   : > { %v1068_v55 = vpop.f32.mrb[64].mxu1  ;;  %v1301_v57 = vpop.f32.mrb[104].mxu0 }
 0x2cb   : > { %v1693_v58 = vmul.f32 0.003921569, %v1068_v55  ;;  %v1695_v59 = vmul.f32 0.003921569, %v1301_v57  ;;  %v1070_v60 = vpop.f32.mrb[65].mxu1  ;;  %v1303_v61 = vpop.f32.mrb[105].mxu0 }
 0x2cc   : > { %v1694_v62 = vmul.f32 0.003921569, %v1070_v60  ;;  %v1696_v63 = vmul.f32 0.003921569, %v1303_v61  ;;  %v1072_v0 = vpop.f32.mrb[66].mxu1  ;;  %v1305_v1 = vpop.f32.mrb[106].mxu0 }
 0x2cd   : > { %1893 = vst [vmem:[%s3243_s1 + $0x500] sm:$0xff] %v1693_v58  ;;  %1895 = vst [vmem:[%s3243_s1 + $0x510] sm:$0xff] %v1695_v59  ;;  %v1698_v2 = vmul.f32 0.003921569, %v1072_v0  ;;  %v1700_v3 = vmul.f32 0.003921569, %v1305_v1 }
 0x2ce   : > { %v1074_v4 = vpop.f32.mrb[67].mxu1  ;;  %v1307_v5 = vpop.f32.mrb[107].mxu0  ;;  %1894 = vst [vmem:[%s3243_s1 + $0x508] sm:$0xff] %v1694_v62  ;;  %1896 = vst [vmem:[%s3243_s1 + $0x518] sm:$0xff] %v1696_v63 }
 0x2cf   : > { %v1699_v6 = vmul.f32 0.003921569, %v1074_v4  ;;  %v1701_v7 = vmul.f32 0.003921569, %v1307_v5  ;;  %1898 = vst [vmem:[%s3243_s1 + $0x528] sm:$0xff] %v1698_v2  ;;  %1900 = vst [vmem:[%s3243_s1 + $0x538] sm:$0xff] %v1700_v3 }
 0x2d1   : > { %1899 = vst [vmem:[%s3243_s1 + $0x530] sm:$0xff] %v1699_v6  ;;  %1901 = vst [vmem:[%s3243_s1 + $0x540] sm:$0xff] %v1701_v7 }
 0x2d2   : > { %v1078_v8 = vpop.f32.mrb[68].mxu1  ;;  %v1311_v9 = vpop.f32.mrb[108].mxu0 }
 0x2d3   : > { %v1703_v10 = vmul.f32 0.003921569, %v1078_v8  ;;  %v1705_v11 = vmul.f32 0.003921569, %v1311_v9  ;;  %v1080_v12 = vpop.f32.mrb[69].mxu1  ;;  %v1313_v13 = vpop.f32.mrb[109].mxu0 }
 0x2d4   : > { %v1704_v14 = vmul.f32 0.003921569, %v1080_v12  ;;  %v1706_v15 = vmul.f32 0.003921569, %v1313_v13  ;;  %v1082_v16 = vpop.f32.mrb[70].mxu1  ;;  %v1315_v17 = vpop.f32.mrb[110].mxu0 }
 0x2d5   : > { %1903 = vst [vmem:[%s3243_s1 + $0x550] sm:$0xff] %v1703_v10  ;;  %1905 = vst [vmem:[%s3243_s1 + $0x560] sm:$0xff] %v1705_v11  ;;  %v1708_v18 = vmul.f32 0.003921569, %v1082_v16  ;;  %v1710_v19 = vmul.f32 0.003921569, %v1315_v17 }
 0x2d6   : > { %v1084_v20 = vpop.f32.mrb[71].mxu1  ;;  %v1317_v21 = vpop.f32.mrb[111].mxu0  ;;  %1904 = vst [vmem:[%s3243_s1 + $0x558] sm:$0xff] %v1704_v14  ;;  %1906 = vst [vmem:[%s3243_s1 + $0x568] sm:$0xff] %v1706_v15 }
 0x2d7   : > { %v1709_v22 = vmul.f32 0.003921569, %v1084_v20  ;;  %v1711_v23 = vmul.f32 0.003921569, %v1317_v21  ;;  %1908 = vst [vmem:[%s3243_s1 + $0x578] sm:$0xff] %v1708_v18  ;;  %1910 = vst [vmem:[%s3243_s1 + $0x588] sm:$0xff] %v1710_v19 }
 0x2d9   : > { %1909 = vst [vmem:[%s3243_s1 + $0x580] sm:$0xff] %v1709_v22  ;;  %1911 = vst [vmem:[%s3243_s1 + $0x590] sm:$0xff] %v1711_v23 }
 0x2da   : > { %v1088_v24 = vpop.f32.mrb[72].mxu1  ;;  %v1321_v25 = vpop.f32.mrb[112].mxu0 }
 0x2db   : > { %v1713_v26 = vmul.f32 0.003921569, %v1088_v24  ;;  %v1715_v27 = vmul.f32 0.003921569, %v1321_v25  ;;  %v1090_v28 = vpop.f32.mrb[73].mxu1  ;;  %v1323_v29 = vpop.f32.mrb[113].mxu0 }
 0x2dc   : > { %v1714_v30 = vmul.f32 0.003921569, %v1090_v28  ;;  %v1716_v31 = vmul.f32 0.003921569, %v1323_v29  ;;  %v1092_v32 = vpop.f32.mrb[74].mxu1  ;;  %v1325_v33 = vpop.f32.mrb[114].mxu0 }
 0x2dd   : > { %1913 = vst [vmem:[%s3243_s1 + $0x5a0] sm:$0xff] %v1713_v26  ;;  %1915 = vst [vmem:[%s3243_s1 + $0x5b0] sm:$0xff] %v1715_v27  ;;  %v1718_v34 = vmul.f32 0.003921569, %v1092_v32  ;;  %v1720_v35 = vmul.f32 0.003921569, %v1325_v33 }
 0x2de   : > { %v1094_v36 = vpop.f32.mrb[75].mxu1  ;;  %v1327_v37 = vpop.f32.mrb[115].mxu0  ;;  %1914 = vst [vmem:[%s3243_s1 + $0x5a8] sm:$0xff] %v1714_v30  ;;  %1916 = vst [vmem:[%s3243_s1 + $0x5b8] sm:$0xff] %v1716_v31 }
 0x2df   : > { %v1719_v38 = vmul.f32 0.003921569, %v1094_v36  ;;  %v1721_v39 = vmul.f32 0.003921569, %v1327_v37  ;;  %1918 = vst [vmem:[%s3243_s1 + $0x5c8] sm:$0xff] %v1718_v34  ;;  %1920 = vst [vmem:[%s3243_s1 + $0x5d8] sm:$0xff] %v1720_v35 }
 0x2e1   : > { %1919 = vst [vmem:[%s3243_s1 + $0x5d0] sm:$0xff] %v1719_v38  ;;  %1921 = vst [vmem:[%s3243_s1 + $0x5e0] sm:$0xff] %v1721_v39 }
 0x2e2   : > { %v1098_v40 = vpop.f32.mrb[76].mxu1  ;;  %v1331_v41 = vpop.f32.mrb[116].mxu0 }
 0x2e3   : > { %v1723_v42 = vmul.f32 0.003921569, %v1098_v40  ;;  %v1725_v43 = vmul.f32 0.003921569, %v1331_v41  ;;  %v1100_v44 = vpop.f32.mrb[77].mxu1  ;;  %v1333_v45 = vpop.f32.mrb[117].mxu0 }
 0x2e4   : > { %v1724_v46 = vmul.f32 0.003921569, %v1100_v44  ;;  %v1726_v47 = vmul.f32 0.003921569, %v1333_v45  ;;  %v1102_v48 = vpop.f32.mrb[78].mxu1  ;;  %v1335_v49 = vpop.f32.mrb[118].mxu0 }
 0x2e5   : > { %1923 = vst [vmem:[%s3243_s1 + $0x5f0] sm:$0xff] %v1723_v42  ;;  %1925 = vst [vmem:[%s3243_s1 + $0x600] sm:$0xff] %v1725_v43  ;;  %v1728_v50 = vmul.f32 0.003921569, %v1102_v48  ;;  %v1730_v51 = vmul.f32 0.003921569, %v1335_v49 }
 0x2e6   : > { %v1104_v52 = vpop.f32.mrb[79].mxu1  ;;  %v1337_v53 = vpop.f32.mrb[119].mxu0  ;;  %1924 = vst [vmem:[%s3243_s1 + $0x5f8] sm:$0xff] %v1724_v46  ;;  %1926 = vst [vmem:[%s3243_s1 + $0x608] sm:$0xff] %v1726_v47 }
 0x2e7   : > { %v1729_v54 = vmul.f32 0.003921569, %v1104_v52  ;;  %v1731_v56 = vmul.f32 0.003921569, %v1337_v53  ;;  %1928 = vst [vmem:[%s3243_s1 + $0x618] sm:$0xff] %v1728_v50  ;;  %1930 = vst [vmem:[%s3243_s1 + $0x628] sm:$0xff] %v1730_v51 }
 0x2e9   : > { %1929 = vst [vmem:[%s3243_s1 + $0x620] sm:$0xff] %v1729_v54  ;;  %1931 = vst [vmem:[%s3243_s1 + $0x630] sm:$0xff] %v1731_v56 }
 0x2ea   : > { %v2300_v55 = vpop.f32.mrb[80].mxu1 }
 0x2eb   : > { %v1547_v57 = vmul.f32 0.003921569, %v2300_v55  ;;  %v1374_v58 = vpop.f32.mrb[81].mxu1 }
 0x2ec   : > { %v1537_v59 = vmul.f32 0.003921569, %v1374_v58  ;;  %v2301_v60 = vpop.f32.mrb[82].mxu1 }
 0x2ed   : > { %1747 = vst [vmem:[%s3243_s1 + $0x70] sm:$0xff] %v1547_v57  ;;  %v1552_v61 = vmul.f32 0.003921569, %v2301_v60  ;;  %v1377_v62 = vpop.f32.mrb[83].mxu1 }
 0x2ee   : > { %1737 = vst [vmem:[%s3243_s1 + $0x20] sm:$0xff] %v1537_v59  ;;  %v1542_v63 = vmul.f32 0.003921569, %v1377_v62 }
 0x2ef   : > { %1752 = vst [vmem:[%s3243_s1 + $0x98] sm:$0xff] %v1552_v61 }
 0x2f0   : > { %1742 = vst [vmem:[%s3243_s1 + $0x48] sm:$0xff] %v1542_v63 }
 0x2f2   : > { %v2304_v0 = vpop.f32.mrb[84].mxu1 }
 0x2f3   : > { %v1567_v1 = vmul.f32 0.003921569, %v2304_v0  ;;  %v1390_v2 = vpop.f32.mrb[85].mxu1 }
 0x2f4   : > { %v1557_v3 = vmul.f32 0.003921569, %v1390_v2  ;;  %v2305_v4 = vpop.f32.mrb[86].mxu1 }
 0x2f5   : > { %1767 = vst [vmem:[%s3243_s1 + $0x110] sm:$0xff] %v1567_v1  ;;  %v1572_v5 = vmul.f32 0.003921569, %v2305_v4  ;;  %v1393_v6 = vpop.f32.mrb[87].mxu1 }
 0x2f6   : > { %1757 = vst [vmem:[%s3243_s1 + $0xc0] sm:$0xff] %v1557_v3  ;;  %v1562_v7 = vmul.f32 0.003921569, %v1393_v6 }
 0x2f7   : > { %1772 = vst [vmem:[%s3243_s1 + $0x138] sm:$0xff] %v1572_v5 }
 0x2f8   : > { %1762 = vst [vmem:[%s3243_s1 + $0xe8] sm:$0xff] %v1562_v7 }
 0x2fa   : > { %v2308_v8 = vpop.f32.mrb[88].mxu1 }
 0x2fb   : > { %v1587_v9 = vmul.f32 0.003921569, %v2308_v8  ;;  %v1406_v10 = vpop.f32.mrb[89].mxu1 }
 0x2fc   : > { %v1577_v11 = vmul.f32 0.003921569, %v1406_v10  ;;  %v2309_v12 = vpop.f32.mrb[90].mxu1 }
 0x2fd   : > { %1787 = vst [vmem:[%s3243_s1 + $0x1b0] sm:$0xff] %v1587_v9  ;;  %v1592_v13 = vmul.f32 0.003921569, %v2309_v12  ;;  %v1409_v14 = vpop.f32.mrb[91].mxu1 }
 0x2fe   : > { %1777 = vst [vmem:[%s3243_s1 + $0x160] sm:$0xff] %v1577_v11  ;;  %v1582_v15 = vmul.f32 0.003921569, %v1409_v14 }
 0x2ff   : > { %1792 = vst [vmem:[%s3243_s1 + $0x1d8] sm:$0xff] %v1592_v13 }
 0x300   : > { %1782 = vst [vmem:[%s3243_s1 + $0x188] sm:$0xff] %v1582_v15 }
 0x302   : > { %v2312_v16 = vpop.f32.mrb[92].mxu1 }
 0x303   : > { %v1607_v17 = vmul.f32 0.003921569, %v2312_v16  ;;  %v1422_v18 = vpop.f32.mrb[93].mxu1 }
 0x304   : > { %v1597_v19 = vmul.f32 0.003921569, %v1422_v18  ;;  %v2313_v20 = vpop.f32.mrb[94].mxu1 }
 0x305   : > { %1807 = vst [vmem:[%s3243_s1 + $0x250] sm:$0xff] %v1607_v17  ;;  %v1612_v21 = vmul.f32 0.003921569, %v2313_v20  ;;  %v1425_v22 = vpop.f32.mrb[95].mxu1 }
 0x306   : > { %1797 = vst [vmem:[%s3243_s1 + $0x200] sm:$0xff] %v1597_v19  ;;  %v1602_v23 = vmul.f32 0.003921569, %v1425_v22 }
 0x307   : > { %1812 = vst [vmem:[%s3243_s1 + $0x278] sm:$0xff] %v1612_v21 }
 0x308   : > { %1802 = vst [vmem:[%s3243_s1 + $0x228] sm:$0xff] %v1602_v23 }
 0x30a   : > { %v2316_v24 = vpop.f32.mrb[96].mxu1 }
 0x30b   : > { %v1627_v25 = vmul.f32 0.003921569, %v2316_v24  ;;  %v1438_v26 = vpop.f32.mrb[97].mxu1 }
 0x30c   : > { %v1617_v27 = vmul.f32 0.003921569, %v1438_v26  ;;  %v2317_v28 = vpop.f32.mrb[98].mxu1 }
 0x30d   : > { %1827 = vst [vmem:[%s3243_s1 + $0x2f0] sm:$0xff] %v1627_v25  ;;  %v1632_v29 = vmul.f32 0.003921569, %v2317_v28  ;;  %v1441_v30 = vpop.f32.mrb[99].mxu1 }
 0x30e   : > { %1817 = vst [vmem:[%s3243_s1 + $0x2a0] sm:$0xff] %v1617_v27  ;;  %v1622_v31 = vmul.f32 0.003921569, %v1441_v30 }
 0x30f   : > { %1832 = vst [vmem:[%s3243_s1 + $0x318] sm:$0xff] %v1632_v29 }
 0x310   : > { %1822 = vst [vmem:[%s3243_s1 + $0x2c8] sm:$0xff] %v1622_v31 }
 0x312   : > { %v2320_v32 = vpop.f32.mrb[100].mxu1 }
 0x313   : > { %v1647_v33 = vmul.f32 0.003921569, %v2320_v32  ;;  %v1454_v34 = vpop.f32.mrb[101].mxu1 }
 0x314   : > { %v1637_v35 = vmul.f32 0.003921569, %v1454_v34  ;;  %v2321_v36 = vpop.f32.mrb[102].mxu1 }
 0x315   : > { %1847 = vst [vmem:[%s3243_s1 + $0x390] sm:$0xff] %v1647_v33  ;;  %v1652_v37 = vmul.f32 0.003921569, %v2321_v36  ;;  %v1457_v38 = vpop.f32.mrb[103].mxu1 }
 0x316   : > { %1837 = vst [vmem:[%s3243_s1 + $0x340] sm:$0xff] %v1637_v35  ;;  %v1642_v39 = vmul.f32 0.003921569, %v1457_v38 }
 0x317   : > { %1852 = vst [vmem:[%s3243_s1 + $0x3b8] sm:$0xff] %v1652_v37 }
 0x318   : > { %1842 = vst [vmem:[%s3243_s1 + $0x368] sm:$0xff] %v1642_v39 }
 0x31a   : > { %v2324_v40 = vpop.f32.mrb[104].mxu1 }
 0x31b   : > { %v1667_v41 = vmul.f32 0.003921569, %v2324_v40  ;;  %v1470_v42 = vpop.f32.mrb[105].mxu1 }
 0x31c   : > { %v1657_v43 = vmul.f32 0.003921569, %v1470_v42  ;;  %v2325_v44 = vpop.f32.mrb[106].mxu1 }
 0x31d   : > { %1867 = vst [vmem:[%s3243_s1 + $0x430] sm:$0xff] %v1667_v41  ;;  %v1672_v45 = vmul.f32 0.003921569, %v2325_v44  ;;  %v1473_v46 = vpop.f32.mrb[107].mxu1 }
 0x31e   : > { %1857 = vst [vmem:[%s3243_s1 + $0x3e0] sm:$0xff] %v1657_v43  ;;  %v1662_v47 = vmul.f32 0.003921569, %v1473_v46 }
 0x31f   : > { %1872 = vst [vmem:[%s3243_s1 + $0x458] sm:$0xff] %v1672_v45 }
 0x320   : > { %1862 = vst [vmem:[%s3243_s1 + $0x408] sm:$0xff] %v1662_v47 }
 0x322   : > { %v2328_v48 = vpop.f32.mrb[108].mxu1 }
 0x323   : > { %v1687_v49 = vmul.f32 0.003921569, %v2328_v48  ;;  %v1486_v50 = vpop.f32.mrb[109].mxu1 }
 0x324   : > { %v1677_v51 = vmul.f32 0.003921569, %v1486_v50  ;;  %v2329_v52 = vpop.f32.mrb[110].mxu1 }
 0x325   : > { %1887 = vst [vmem:[%s3243_s1 + $0x4d0] sm:$0xff] %v1687_v49  ;;  %v1692_v53 = vmul.f32 0.003921569, %v2329_v52  ;;  %v1489_v54 = vpop.f32.mrb[111].mxu1 }
 0x326   : > { %1877 = vst [vmem:[%s3243_s1 + $0x480] sm:$0xff] %v1677_v51  ;;  %v1682_v56 = vmul.f32 0.003921569, %v1489_v54 }
 0x327   : > { %1892 = vst [vmem:[%s3243_s1 + $0x4f8] sm:$0xff] %v1692_v53 }
 0x328   : > { %1882 = vst [vmem:[%s3243_s1 + $0x4a8] sm:$0xff] %v1682_v56 }
 0x32a   : > { %v2332_v55 = vpop.f32.mrb[112].mxu1 }
 0x32b   : > { %v1707_v57 = vmul.f32 0.003921569, %v2332_v55  ;;  %v1502_v58 = vpop.f32.mrb[113].mxu1 }
 0x32c   : > { %v1697_v59 = vmul.f32 0.003921569, %v1502_v58  ;;  %v2333_v60 = vpop.f32.mrb[114].mxu1 }
 0x32d   : > { %1907 = vst [vmem:[%s3243_s1 + $0x570] sm:$0xff] %v1707_v57  ;;  %v1712_v61 = vmul.f32 0.003921569, %v2333_v60  ;;  %v1505_v62 = vpop.f32.mrb[115].mxu1 }
 0x32e   : > { %1897 = vst [vmem:[%s3243_s1 + $0x520] sm:$0xff] %v1697_v59  ;;  %v1702_v63 = vmul.f32 0.003921569, %v1505_v62 }
 0x32f   : > { %1912 = vst [vmem:[%s3243_s1 + $0x598] sm:$0xff] %v1712_v61 }
 0x330   : > { %1902 = vst [vmem:[%s3243_s1 + $0x548] sm:$0xff] %v1702_v63 }
 0x332   : > { %v2336_v0 = vpop.f32.mrb[116].mxu1 }
 0x333   : > { %v1727_v1 = vmul.f32 0.003921569, %v2336_v0  ;;  %v1518_v2 = vpop.f32.mrb[117].mxu1 }
 0x334   : > { %v1717_v3 = vmul.f32 0.003921569, %v1518_v2  ;;  %v2337_v4 = vpop.f32.mrb[118].mxu1 }
 0x335   : > { %1927 = vst [vmem:[%s3243_s1 + $0x610] sm:$0xff] %v1727_v1  ;;  %v1732_v5 = vmul.f32 0.003921569, %v2337_v4  ;;  %v1521_v6 = vpop.f32.mrb[119].mxu1 }
 0x336   : > { %1917 = vst [vmem:[%s3243_s1 + $0x5c0] sm:$0xff] %v1717_v3  ;;  %v1722_v7 = vmul.f32 0.003921569, %v1521_v6 }
 0x337   : > { %1932 = vst [vmem:[%s3243_s1 + $0x638] sm:$0xff] %v1732_v5 }
 0x338   : > { %1922 = vst [vmem:[%s3243_s1 + $0x5e8] sm:$0xff] %v1722_v7 }
 0x339   : > { %2624 = shalt.err (!%p2621_p5)
}
 0x33a   : > { %s2625_s30 = scalar_lea.hbm %s3461_s29, 25600  ;;  %s2629_s25 = scalar_lea.hbm %s3566_s26, 153600 }
 0x33b   : > { %p2626_p8 = scmp.ne.s32.totalorder %s3461_s29, %s2625_s30  ;;  %p2630_p6 = scmp.lt.u32.totalorder %s3461_s29, %s3566_s26 }
 0x33c   : > { %p2631_p10 = scmp.lt.u32.totalorder %s2629_s25, %s2625_s30  ;;  %p2633_p4 = scmp.lt.u32.totalorder %s2625_s30, %s3461_s29 }
 0x33d   : > { %p2627_p12 = pnand %p2626_p8, %p3567_p1 }
 0x33e   : > { %p2632_p0 = por %p2631_p10, %p2630_p6 }
 0x33f   : > { %p2628_p2 = pneg %p2627_p12 }
 0x340   : > { %p2634_p3 = por %p2633_p4, %p2632_p0 }
 0x342   : > { %p2635_p7 = pnand %p2634_p3, %p2628_p2 }
 0x344   : > { %2638 = shalt.err (!%p2635_p7)
}
 0x345   : > { %s2750_s6 = smov 640   ;;  %s2751_s8 = smov 40  }
 0x346   : > { %2356 = dma.vmem_to_hbm [thread:$0]  (%p3567_p1), %s3455_s4, 25600, %s3461_s29, %s3467_s20, %s2750_s6, %s2750_s6, %s2751_s8  }
 0x347 PF: > { %s3568_s24 = sld [smem:[#allocation12_spill]]  ;;  %s3569_s18 = sld [smem:[#allocation14_spill]] }
 0x348   : > { %p2379_p9 = scmp.ge.s32.totalorder %s2737_s22, 2 }
 0x34d   : > { %s1965_s19 = sand.u32 1, %s3568_s24   ;;  %p3570_p13 = scmp.ne.s32.totalorder %s3569_s18, 0 }
 0x34e   : > { %s1966_s5 = scalar_lea.sflag [#allocation4], %s1965_s19 }
 0x34f   : > { %p2370_p11 = pnand %p2379_p9, %p3570_p13 }
 0x351   : > { %2692 = dma.done.wait (!%p2370_p11), %s1966_s5, 25600  }
 0x352   : > { %2694 = vsyncadd (!%p2370_p11), %s1966_s5, 4294941696  ;;  %s20_s22 = sadd.s32 1, %s2737_s22   ;;  %s3571_s18 = sld [smem:[#allocation13_spill]] }
 0x353   : > { %p17_p5 = scmp.ge.s32.totalorder %s20_s22, 8   ;;  %s3572_s20 = sld [smem:[#allocation15_spill]] }
 0x354   : > { %s3573_s28 = sld [smem:[#allocation16_spill]]  ;;  %s3574_s12 = smov %s2701_s13 }
 0x355   : > { %s3575_s13 = smov %s2705_s14  ;;  %s3576_s14 = smov %s2943_s2 }
 0x356   : > { %s3577_s15 = smov %s2713_s16  ;;  %s3578_s16 = smov %s2717_s17 }
 0x357   : > { %s3579_s17 = smov %s2938_s9  ;;  %s3580_s19 = smov %s2733_s21 }
 0x358   :  { %19 = sbr.rel (!%p17_p5) target bundleno = 14 (0xe), region = 86 }
 0x35a   : > { %s3581_s21 = smov %s3573_s28 }
 0x35f   :  { %1971 = vsyncpa [#allocation3], 1 }
 0x360   :  { %1973 = vsyncpa [#allocation3 + $0x1], 1 }
 0x361   :  { %1974 = vsyncpa [#allocation6], 1 }
 0x362   :  { %1975 = vsyncpa [#allocation4], 1 }
 0x363   :  { %1977 = vsyncpa [#allocation4 + $0x1], 1 }

</bundles_post_ra>
